<compile_context>
chip_gen: v6e
topology: v6e:2x2x1
jax: 0.10.0
libtpu: 0.0.40
codegen_flags: <defaults>
</compile_context>

<pallas_src>
import numpy as np
import jax
import jax.numpy as jnp
from jax import lax
from jax.experimental import pallas as pl
from jax.experimental.pallas import tpu as pltpu


_CH = 128  # lane width of one selection sub-chunk (1 vreg wide)


def _make_fp_kernel(num_layers, n_neighbors, mlp_dtype):
    """Per (batch, point-tile) kernel: 3-NN interpolation + fused MLP stack."""

    def kernel(*refs):
        (xyz1_ref, xyz2_ref, p1_ref, p2_ref,
         w1p_ref, w1i_ref, b1_ref) = refs[:7]
        layer_refs = refs[7:-2]          # (W_l, b_l) pairs for layers 1..L-1
        out_ref = refs[-2]               # (C_last, TN)
        interp_ref = refs[-1]            # VMEM scratch (D2, TN) f32

        x2 = xyz2_ref[...]               # (C, S)   source positions
        p2 = p2_ref[...]                 # (D2, S)  source features
        C, S = x2.shape
        TN = out_ref.shape[1]
        n_chunks = TN // _CH

        # Grid-invariant source-side quantities: hoist out of the chunk loop.
        n2 = jnp.sum(x2 * x2, axis=0, keepdims=True)                  # (1, S)
        aug2 = jnp.concatenate([-2.0 * x2, n2], axis=0)               # (C+1, S), tiny
        iota = lax.broadcasted_iota(jnp.int32, (S, _CH), 0)

        def chunk_body(c, carry):
            off = pl.multiple_of(c * _CH, _CH)
            x1 = xyz1_ref[:, pl.ds(off, _CH)]                         # (C, CH)
            n1 = jnp.sum(x1 * x1, axis=0, keepdims=True)              # (1, CH)
            aug1 = jnp.concatenate(
                [x1, jnp.ones((1, _CH), jnp.float32)], axis=0)        # (C+1, CH)
            # d[s,n] = |x2_s|^2 + |x1_n|^2 - 2 x2_s.x1_n.  K = C+1 = 4, so this
            # matmul (and any tiny transpose of the (4,S) aug2) is negligible;
            # folding |x2|^2 into it avoids (S,CH) broadcasts on the VPU.
            d = lax.dot_general(aug2, aug1, (((0,), (0,)), ((), ())),
                                preferred_element_type=jnp.float32) + n1
            d = jnp.maximum(d, 0.0)      # guard tiny negatives of the expansion

            # 3-NN selection: exact f32 min + lowest-index argmin per pass.
            work = d
            wmat = jnp.zeros((S, _CH), jnp.float32)
            norm = jnp.zeros((1, _CH), jnp.float32)
            for _ in range(n_neighbors):
                mval = jnp.min(work, axis=0, keepdims=True)           # (1, CH)
                cand = jnp.where(work == mval, iota, S)               # tie -> low idx
                aidx = jnp.min(cand, axis=0, keepdims=True)           # (1, CH)
                sel = iota == aidx                                    # one-hot
                recip = 1.0 / (mval + 1e-8)
                wmat = jnp.where(sel, recip, wmat)   # each slot selected once
                norm = norm + recip
                work = jnp.where(sel, jnp.float32(jnp.inf), work)

            # Interpolate with raw reciprocals and normalise AFTER the matmul
            # (linear, so identical to normalising the weights first).
            interp_c = jnp.dot(p2, wmat, preferred_element_type=jnp.float32)
            interp_c = interp_c * pl.reciprocal(norm, approx=False)   # (D2, CH)
            interp_ref[:, pl.ds(off, _CH)] = interp_c
            return carry

        lax.fori_loop(0, n_chunks, chunk_body, 0, unroll=True)

        # MLP stack: 1x1 Conv1d (+ folded BN) + ReLU.  First-layer weight is
        # split so the [points1 ; interpolated] concat never materialises.
        # Matmul operands run in `mlp_dtype` (bf16 by default) with f32 MXU
        # accumulation; all elementwise math stays f32.
        p1 = p1_ref[...].astype(mlp_dtype)                            # (D1, TN)
        interp = interp_ref[...].astype(mlp_dtype)                    # (D2, TN)
        h = (jnp.dot(w1p_ref[...], p1, preferred_element_type=jnp.float32)
             + jnp.dot(w1i_ref[...], interp, preferred_element_type=jnp.float32))
        h = jnp.maximum(h + b1_ref[...], 0.0)
        for l in range(num_layers - 1):
            w = layer_refs[2 * l][...]                                # (C_out, C_in)
            b = layer_refs[2 * l + 1][...]                            # (C_out, 1)
            h = jnp.maximum(
                jnp.dot(w, h.astype(mlp_dtype),
                        preferred_element_type=jnp.float32) + b, 0.0)

        out_ref[...] = h                                              # (C_last, TN)

    return kernel


def _choose_point_tile(n, batch):
    """Lane-dense point tile (<=512); guarantee >=2 grid steps for v7x megacore."""
    if n >= 512:
        tn = 512
    elif n >= 256:
        tn = 256
    else:
        tn = 128
    while tn > 128 and batch * ((n + tn - 1) // tn) < 2:
        tn //= 2
    return tn


def pointnet_feature_propagation(xyz1, xyz2, points1, points2, fused_params,
                                 *, mlp_dtype=jnp.bfloat16):
    """
    xyz1:    [B, C, N]   target point positions (channel-first, as in PyTorch)
    xyz2:    [B, C, S]   source point positions
    points1: [B, D1, N]  features at target points
    points2: [B, D2, S]  features at source points
    fused_params: list of (W [C_out, C_in], b [C_out, 1]) with BN folded in;
                  first layer C_in must equal D1 + D2.
    mlp_dtype: operand dtype for the MLP matmuls (f32 MXU accumulation).
    Returns new_points [B, D_last, N]  (matches the PyTorch module output).
    """
    B, C, N = xyz1.shape
    _, _, S = xyz2.shape
    D1 = points1.shape[1]
    D2 = points2.shape[1]
    num_layers = len(fused_params)
    c_last = fused_params[-1][0].shape[0]

    TN = _choose_point_tile(N, B)
    N_pad = ((N + TN - 1) // TN) * TN

    xyz1 = xyz1.astype(jnp.float32)
    points1 = points1.astype(jnp.float32)
    if N_pad != N:
        # Pad the point axis so every tile is a full lane-dense TN block (no
        # masked partial stores, no full-N fallback); padded columns are
        # computed on dummy data and sliced off below.
        pad = ((0, 0), (0, 0), (0, N_pad - N))
        xyz1 = jnp.pad(xyz1, pad)
        points1 = jnp.pad(points1, pad)

    # Split first layer weight: columns for points1 and for interpolated points2.
    w1, b1 = fused_params[0]
    w1_p1 = w1[:, :D1].astype(mlp_dtype)
    w1_in = w1[:, D1:].astype(mlp_dtype)
    b1 = b1.astype(jnp.float32)

    def const_spec(shape):
        return pl.BlockSpec(shape, lambda b, n: (0, 0))

    in_specs = [
        pl.BlockSpec((None, C, TN), lambda b, n: (b, 0, n)),
        pl.BlockSpec((None, C, S), lambda b, n: (b, 0, 0)),
        pl.BlockSpec((None, D1, TN), lambda b, n: (b, 0, n)),
        pl.BlockSpec((None, D2, S), lambda b, n: (b, 0, 0)),
        const_spec(w1_p1.shape),
        const_spec(w1_in.shape),
        const_spec(b1.shape),
    ]
    args = [xyz1, xyz2.astype(jnp.float32), points1,
            points2.astype(jnp.float32), w1_p1, w1_in, b1]
    for (w, b) in fused_params[1:]:
        in_specs.append(const_spec(w.shape))
        args.append(w.astype(mlp_dtype))
        in_specs.append(const_spec(b.shape))
        args.append(b.astype(jnp.float32))

    out = pl.pallas_call(
        _make_fp_kernel(num_layers, 3, mlp_dtype),
        out_shape=jax.ShapeDtypeStruct((B, c_last, N_pad), jnp.float32),
        grid=(B, N_pad // TN),
        in_specs=in_specs,
        out_specs=pl.BlockSpec((None, c_last, TN), lambda b, n: (b, 0, n)),
        scratch_shapes=[pltpu.VMEM((D2, TN), jnp.float32)],
        compiler_params=pltpu.CompilerParams(
            dimension_semantics=("parallel", "parallel"),
            # Explicit budget: above v5e's 16 MiB default scoped limit, and
            # <= ~48 MiB so it still fits comfortably in v7x's 64 MiB VMEM.
            vmem_limit_bytes=48 * 1024 * 1024),
    )(*args)
    return out[:, :, :N] if N_pad != N else out


def _init_params(key, mlp_list):
    """Deterministic Conv1d(1x1)+BatchNorm1d params, BN folded into (W, b)."""
    eps = 1e-5
    fused = []
    for i in range(len(mlp_list) - 1):
        c_in, c_out = mlp_list[i], mlp_list[i + 1]
        key, kw, kb = jax.random.split(key, 3)
        W = 0.1 * jax.random.normal(kw, (c_out, c_in), jnp.float32)   # Conv1d weight (k=1)
        b = 0.1 * jax.random.normal(kb, (c_out,), jnp.float32)        # Conv1d bias
        gamma = jnp.ones((c_out,), jnp.float32)                       # BN weight
        beta = jnp.zeros((c_out,), jnp.float32)                       # BN bias
        mean = jnp.zeros((c_out,), jnp.float32)                       # BN running_mean
        var = jnp.ones((c_out,), jnp.float32)                         # BN running_var
        a = gamma / jnp.sqrt(var + eps)
        W_f = W * a[:, None]
        b_f = (a * (b - mean) + beta)[:, None]                        # (c_out, 1)
        fused.append((W_f, b_f))
    return fused


def _reference(xyz1, xyz2, points1, points2, fused_params, mlp_dtype=jnp.float32):
    """Pure-JAX mirror of the PyTorch forward (S > 1, points1 != None path)."""
    hp = lax.Precision.HIGHEST
    x1 = jnp.transpose(xyz1, (0, 2, 1))                               # [B,N,C]
    x2 = jnp.transpose(xyz2, (0, 2, 1))                               # [B,S,C]
    p2 = jnp.transpose(points2, (0, 2, 1))                            # [B,S,D2]
    d = (jnp.sum(x1 ** 2, -1)[:, :, None] + jnp.sum(x2 ** 2, -1)[:, None, :]
         - 2.0 * jnp.einsum('bnc,bsc->bns', x1, x2, precision=hp))    # [B,N,S]
    idx = jnp.argsort(d, axis=-1)[:, :, :3]                           # [B,N,3]
    dists = jnp.take_along_axis(d, idx, axis=-1)
    recip = 1.0 / (dists + 1e-8)
    norm = jnp.sum(recip, axis=-1, keepdims=True)
    w = recip / norm
    gathered = jax.vmap(lambda f, i: f[i])(p2, idx)                   # [B,N,3,D2]
    interp = jnp.sum(gathered * w[..., None], axis=2)                 # [B,N,D2]
    p1 = jnp.transpose(points1, (0, 2, 1))                            # [B,N,D1]
    h = jnp.transpose(jnp.concatenate([p1, interp], axis=-1), (0, 2, 1))  # [B,C_in,N]
    for W_f, b_f in fused_params:
        Wc = W_f.astype(mlp_dtype).astype(jnp.float32)                # emulate operand dtype
        hc = h.astype(mlp_dtype).astype(jnp.float32)
        h = jnp.maximum(jnp.einsum('oc,bcn->bon', Wc, hc, precision=hp)
                        + b_f[None], 0.0)
    return h


if __name__ == "__main__":
    key = jax.random.PRNGKey(0)
    B, C, S, D1, D2 = 2, 3, 64, 16, 16
    mlp_list = [D1 + D2, 64, 64]       # SeqLinear channels (input = D1 + D2)

    key, k1, k2, k3, k4 = jax.random.split(key, 5)
    fused_params = _init_params(key, mlp_list)

    N = 256
    xyz1 = jax.random.normal(k1, (B, C, N), jnp.float32)
    xyz2 = jax.random.normal(k2, (B, C, S), jnp.float32)
    points1 = jax.random.normal(k3, (B, D1, N), jnp.float32)
    points2 = jax.random.normal(k4, (B, D2, S), jnp.float32)

    # Case 1: f32 MLP operands, N multiple of the tile -> strict f32 check.
    out32 = pointnet_feature_propagation(xyz1, xyz2, points1, points2,
                                         fused_params, mlp_dtype=jnp.float32)
    jax.block_until_ready(out32)
    ref32 = _reference(xyz1, xyz2, points1, points2, fused_params)
    assert out32.shape == (B, mlp_list[-1], N)
    np.testing.assert_allclose(np.asarray(out32), np.asarray(ref32),
                               rtol=1e-4, atol=1e-4)

    # Case 2: default bf16 MLP operands + N not a multiple of 128
    # (exercises the pad-to-tile / slice-back path).
    N2 = 200
    out16 = pointnet_feature_propagation(xyz1[:, :, :N2], xyz2,
                                         points1[:, :, :N2], points2,
                                         fused_params)                # bf16 default
    jax.block_until_ready(out16)
    ref16 = _reference(xyz1[:, :, :N2], xyz2, points1[:, :, :N2], points2,
                       fused_params, mlp_dtype=jnp.bfloat16)
    assert out16.shape == (B, mlp_list[-1], N2)
    np.testing.assert_allclose(np.asarray(out16), np.asarray(ref16),
                               rtol=1e-2, atol=1e-2)

    print("KERNEL_OK")
</pallas_src>

<mosaic_0001>
module attributes {stable_mosaic.version = 11 : i64} {
  func.func @kernel(%arg0: i32, %arg1: i32, %arg2: memref<1x3x256xf32, #tpu.memory_space<vmem>>, %arg3: memref<1x3x64xf32, #tpu.memory_space<vmem>>, %arg4: memref<1x16x256xf32, #tpu.memory_space<vmem>>, %arg5: memref<1x16x64xf32, #tpu.memory_space<vmem>>, %arg6: memref<64x16xf32, #tpu.memory_space<vmem>>, %arg7: memref<64x16xf32, #tpu.memory_space<vmem>>, %arg8: memref<64x1xf32, #tpu.memory_space<vmem>>, %arg9: memref<64x64xf32, #tpu.memory_space<vmem>>, %arg10: memref<64x1xf32, #tpu.memory_space<vmem>>, %arg11: memref<1x64x256xf32, #tpu.memory_space<vmem>>, %arg12: memref<16x256xf32, #tpu.memory_space<vmem>>) attributes {dimension_semantics = [#tpu.dimension_semantics<parallel>, #tpu.dimension_semantics<parallel>], iteration_bounds = array<i64: 2, 1>, scalar_prefetch = 0 : i64, scratch_operands = 1 : i64, tpu.core_type = #tpu.core_type<tc>, window_params = [{transform_indices = @transform_0, window_bounds = array<i64: 1, 3, 256>}, {transform_indices = @transform_1, window_bounds = array<i64: 1, 3, 64>}, {transform_indices = @transform_2, window_bounds = array<i64: 1, 16, 256>}, {transform_indices = @transform_3, window_bounds = array<i64: 1, 16, 64>}, {pipeline_mode = #tpu.pipeline_mode<synchronous>, transform_indices = @transform_4, window_bounds = array<i64: 64, 16>}, {pipeline_mode = #tpu.pipeline_mode<synchronous>, transform_indices = @transform_5, window_bounds = array<i64: 64, 16>}, {pipeline_mode = #tpu.pipeline_mode<synchronous>, transform_indices = @transform_6, window_bounds = array<i64: 64, 1>}, {pipeline_mode = #tpu.pipeline_mode<synchronous>, transform_indices = @transform_7, window_bounds = array<i64: 64, 64>}, {pipeline_mode = #tpu.pipeline_mode<synchronous>, transform_indices = @transform_8, window_bounds = array<i64: 64, 1>}, {transform_indices = @transform_9, window_bounds = array<i64: 1, 64, 256>}]} {
    %c0 = arith.constant 0 : index
    %c0_0 = arith.constant 0 : index
    %c0_1 = arith.constant 0 : index
    %0 = vector.load %arg3[%c0, %c0_0, %c0_1] : memref<1x3x64xf32, #tpu.memory_space<vmem>>, vector<1x3x64xf32>
    %1 = vector.shape_cast %0 : vector<1x3x64xf32> to vector<3x64xf32>
    %c0_2 = arith.constant 0 : index
    %c0_3 = arith.constant 0 : index
    %c0_4 = arith.constant 0 : index
    %2 = vector.load %arg5[%c0_2, %c0_3, %c0_4] : memref<1x16x64xf32, #tpu.memory_space<vmem>>, vector<1x16x64xf32>
    %3 = vector.shape_cast %2 : vector<1x16x64xf32> to vector<16x64xf32>
    %4 = arith.mulf %1, %1 : vector<3x64xf32>
    %cst = arith.constant dense<0.000000e+00> : vector<64xf32>
    %5 = vector.multi_reduction <add>, %4, %cst [0] : vector<3x64xf32> to vector<64xf32>
    %6 = vector.shape_cast %5 : vector<64xf32> to vector<1x64xf32>
    %cst_5 = arith.constant -2.000000e+00 : f32
    %7 = vector.broadcast %cst_5 : f32 to vector<3x64xf32>
    %8 = arith.mulf %7, %1 : vector<3x64xf32>
    %9 = tpu.concatenate %8, %6 in 0 : vector<3x64xf32>, vector<1x64xf32> -> vector<4x64xf32>
    %10 = tpu.iota {dimensions = array<i32: 0>} : vector<64x128xi32>
    %c0_i32 = arith.constant 0 : i32
    %c128_i32 = arith.constant 128 : i32
    %11 = arith.muli %c0_i32, %c128_i32 : i32
    %12 = tpu.assume_multiple %11, 128 : i32
    %c0_6 = arith.constant 0 : index
    %c0_7 = arith.constant 0 : index
    %13 = arith.index_cast %12 : i32 to index
    %14 = vector.load %arg2[%c0_6, %c0_7, %13] : memref<1x3x256xf32, #tpu.memory_space<vmem>>, vector<1x3x128xf32>
    %15 = vector.shape_cast %14 : vector<1x3x128xf32> to vector<3x128xf32>
    %16 = arith.mulf %15, %15 : vector<3x128xf32>
    %cst_8 = arith.constant dense<0.000000e+00> : vector<128xf32>
    %17 = vector.multi_reduction <add>, %16, %cst_8 [0] : vector<3x128xf32> to vector<128xf32>
    %18 = vector.shape_cast %17 : vector<128xf32> to vector<1x128xf32>
    %cst_9 = arith.constant 1.000000e+00 : f32
    %19 = vector.broadcast %cst_9 : f32 to vector<1x128xf32>
    %20 = tpu.concatenate %15, %19 in 0 : vector<3x128xf32>, vector<1x128xf32> -> vector<4x128xf32>
    %cst_10 = arith.constant dense<0.000000e+00> : vector<64x128xf32>
    %21 = tpu.matmul %9, %20, %cst_10 {dimension_numbers = #tpu.dot_dimension_numbers<[0], [0], [1], [1], [0, 1, 1, 1], [], []>} : vector<4x64xf32>, vector<4x128xf32>, vector<64x128xf32> -> vector<64x128xf32>
    %22 = vector.broadcast %18 : vector<1x128xf32> to vector<64x128xf32>
    %23 = arith.addf %21, %22 : vector<64x128xf32>
    %cst_11 = arith.constant 0.000000e+00 : f32
    %24 = vector.broadcast %cst_11 : f32 to vector<64x128xf32>
    %25 = arith.maximumf %23, %24 : vector<64x128xf32>
    %cst_12 = arith.constant 0.000000e+00 : f32
    %26 = vector.broadcast %cst_12 : f32 to vector<64x128xf32>
    %cst_13 = arith.constant 0.000000e+00 : f32
    %27 = vector.broadcast %cst_13 : f32 to vector<1x128xf32>
    %cst_14 = arith.constant dense<0x7F800000> : vector<128xf32>
    %28 = vector.multi_reduction <minimumf>, %25, %cst_14 [0] : vector<64x128xf32> to vector<128xf32>
    %29 = vector.shape_cast %28 : vector<128xf32> to vector<1x128xf32>
    %30 = vector.broadcast %29 : vector<1x128xf32> to vector<64x128xf32>
    %31 = arith.cmpf oeq, %25, %30 : vector<64x128xf32>
    %c64_i32 = arith.constant 64 : i32
    %32 = vector.broadcast %c64_i32 : i32 to vector<64x128xi32>
    %33 = arith.select %31, %10, %32 : vector<64x128xi1>, vector<64x128xi32>
    %cst_15 = arith.constant dense<2147483647> : vector<128xi32>
    %34 = vector.multi_reduction <minsi>, %33, %cst_15 [0] : vector<64x128xi32> to vector<128xi32>
    %35 = vector.shape_cast %34 : vector<128xi32> to vector<1x128xi32>
    %36 = vector.broadcast %35 : vector<1x128xi32> to vector<64x128xi32>
    %37 = arith.cmpi eq, %10, %36 : vector<64x128xi32>
    %cst_16 = arith.constant 9.99999993E-9 : f32
    %38 = vector.broadcast %cst_16 : f32 to vector<1x128xf32>
    %39 = arith.addf %29, %38 : vector<1x128xf32>
    %cst_17 = arith.constant 1.000000e+00 : f32
    %40 = vector.broadcast %cst_17 : f32 to vector<1x128xf32>
    %41 = arith.divf %40, %39 : vector<1x128xf32>
    %42 = vector.shape_cast %41 : vector<1x128xf32> to vector<1x128xf32>
    %43 = vector.broadcast %42 : vector<1x128xf32> to vector<64x128xf32>
    %44 = arith.select %37, %43, %26 : vector<64x128xi1>, vector<64x128xf32>
    %45 = arith.addf %27, %41 : vector<1x128xf32>
    %cst_18 = arith.constant 0x7F800000 : f32
    %46 = vector.broadcast %cst_18 : f32 to vector<64x128xf32>
    %47 = arith.select %37, %46, %25 : vector<64x128xi1>, vector<64x128xf32>
    %cst_19 = arith.constant dense<0x7F800000> : vector<128xf32>
    %48 = vector.multi_reduction <minimumf>, %47, %cst_19 [0] : vector<64x128xf32> to vector<128xf32>
    %49 = vector.shape_cast %48 : vector<128xf32> to vector<1x128xf32>
    %50 = vector.broadcast %49 : vector<1x128xf32> to vector<64x128xf32>
    %51 = arith.cmpf oeq, %47, %50 : vector<64x128xf32>
    %c64_i32_20 = arith.constant 64 : i32
    %52 = vector.broadcast %c64_i32_20 : i32 to vector<64x128xi32>
    %53 = arith.select %51, %10, %52 : vector<64x128xi1>, vector<64x128xi32>
    %cst_21 = arith.constant dense<2147483647> : vector<128xi32>
    %54 = vector.multi_reduction <minsi>, %53, %cst_21 [0] : vector<64x128xi32> to vector<128xi32>
    %55 = vector.shape_cast %54 : vector<128xi32> to vector<1x128xi32>
    %56 = vector.broadcast %55 : vector<1x128xi32> to vector<64x128xi32>
    %57 = arith.cmpi eq, %10, %56 : vector<64x128xi32>
    %cst_22 = arith.constant 9.99999993E-9 : f32
    %58 = vector.broadcast %cst_22 : f32 to vector<1x128xf32>
    %59 = arith.addf %49, %58 : vector<1x128xf32>
    %cst_23 = arith.constant 1.000000e+00 : f32
    %60 = vector.broadcast %cst_23 : f32 to vector<1x128xf32>
    %61 = arith.divf %60, %59 : vector<1x128xf32>
    %62 = vector.shape_cast %61 : vector<1x128xf32> to vector<1x128xf32>
    %63 = vector.broadcast %62 : vector<1x128xf32> to vector<64x128xf32>
    %64 = arith.select %57, %63, %44 : vector<64x128xi1>, vector<64x128xf32>
    %65 = arith.addf %45, %61 : vector<1x128xf32>
    %cst_24 = arith.constant 0x7F800000 : f32
    %66 = vector.broadcast %cst_24 : f32 to vector<64x128xf32>
    %67 = arith.select %57, %66, %47 : vector<64x128xi1>, vector<64x128xf32>
    %cst_25 = arith.constant dense<0x7F800000> : vector<128xf32>
    %68 = vector.multi_reduction <minimumf>, %67, %cst_25 [0] : vector<64x128xf32> to vector<128xf32>
    %69 = vector.shape_cast %68 : vector<128xf32> to vector<1x128xf32>
    %70 = vector.broadcast %69 : vector<1x128xf32> to vector<64x128xf32>
    %71 = arith.cmpf oeq, %67, %70 : vector<64x128xf32>
    %c64_i32_26 = arith.constant 64 : i32
    %72 = vector.broadcast %c64_i32_26 : i32 to vector<64x128xi32>
    %73 = arith.select %71, %10, %72 : vector<64x128xi1>, vector<64x128xi32>
    %cst_27 = arith.constant dense<2147483647> : vector<128xi32>
    %74 = vector.multi_reduction <minsi>, %73, %cst_27 [0] : vector<64x128xi32> to vector<128xi32>
    %75 = vector.shape_cast %74 : vector<128xi32> to vector<1x128xi32>
    %76 = vector.broadcast %75 : vector<1x128xi32> to vector<64x128xi32>
    %77 = arith.cmpi eq, %10, %76 : vector<64x128xi32>
    %cst_28 = arith.constant 9.99999993E-9 : f32
    %78 = vector.broadcast %cst_28 : f32 to vector<1x128xf32>
    %79 = arith.addf %69, %78 : vector<1x128xf32>
    %cst_29 = arith.constant 1.000000e+00 : f32
    %80 = vector.broadcast %cst_29 : f32 to vector<1x128xf32>
    %81 = arith.divf %80, %79 : vector<1x128xf32>
    %82 = vector.shape_cast %81 : vector<1x128xf32> to vector<1x128xf32>
    %83 = vector.broadcast %82 : vector<1x128xf32> to vector<64x128xf32>
    %84 = arith.select %77, %83, %64 : vector<64x128xi1>, vector<64x128xf32>
    %85 = arith.addf %65, %81 : vector<1x128xf32>
    %cst_30 = arith.constant dense<0.000000e+00> : vector<16x128xf32>
    %86 = tpu.matmul %3, %84, %cst_30 {dimension_numbers = #tpu.dot_dimension_numbers<[1], [0], [0], [1], [0, 0, 1, 1], [], []>} : vector<16x64xf32>, vector<64x128xf32>, vector<16x128xf32> -> vector<16x128xf32>
    %87 = tpu.reciprocal %85 : vector<1x128xf32> -> vector<1x128xf32>
    %88 = vector.broadcast %87 : vector<1x128xf32> to vector<16x128xf32>
    %89 = arith.mulf %86, %88 : vector<16x128xf32>
    %c0_31 = arith.constant 0 : index
    %90 = arith.index_cast %12 : i32 to index
    %91 = vector.load %arg12[%c0_31, %90] : memref<16x256xf32, #tpu.memory_space<vmem>>, vector<16x128xf32>
    tpu.vector_store %arg12[%c0_31, %90], %89 {strides = array<i32>} : memref<16x256xf32, #tpu.memory_space<vmem>>, vector<16x128xf32>,
    %c1_i32 = arith.constant 1 : i32
    %c128_i32_32 = arith.constant 128 : i32
    %92 = arith.muli %c1_i32, %c128_i32_32 : i32
    %93 = tpu.assume_multiple %92, 128 : i32
    %c0_33 = arith.constant 0 : index
    %c0_34 = arith.constant 0 : index
    %94 = arith.index_cast %93 : i32 to index
    %95 = vector.load %arg2[%c0_33, %c0_34, %94] : memref<1x3x256xf32, #tpu.memory_space<vmem>>, vector<1x3x128xf32>
    %96 = vector.shape_cast %95 : vector<1x3x128xf32> to vector<3x128xf32>
    %97 = arith.mulf %96, %96 : vector<3x128xf32>
    %cst_35 = arith.constant dense<0.000000e+00> : vector<128xf32>
    %98 = vector.multi_reduction <add>, %97, %cst_35 [0] : vector<3x128xf32> to vector<128xf32>
    %99 = vector.shape_cast %98 : vector<128xf32> to vector<1x128xf32>
    %cst_36 = arith.constant 1.000000e+00 : f32
    %100 = vector.broadcast %cst_36 : f32 to vector<1x128xf32>
    %101 = tpu.concatenate %96, %100 in 0 : vector<3x128xf32>, vector<1x128xf32> -> vector<4x128xf32>
    %cst_37 = arith.constant dense<0.000000e+00> : vector<64x128xf32>
    %102 = tpu.matmul %9, %101, %cst_37 {dimension_numbers = #tpu.dot_dimension_numbers<[0], [0], [1], [1], [0, 1, 1, 1], [], []>} : vector<4x64xf32>, vector<4x128xf32>, vector<64x128xf32> -> vector<64x128xf32>
    %103 = vector.broadcast %99 : vector<1x128xf32> to vector<64x128xf32>
    %104 = arith.addf %102, %103 : vector<64x128xf32>
    %cst_38 = arith.constant 0.000000e+00 : f32
    %105 = vector.broadcast %cst_38 : f32 to vector<64x128xf32>
    %106 = arith.maximumf %104, %105 : vector<64x128xf32>
    %cst_39 = arith.constant 0.000000e+00 : f32
    %107 = vector.broadcast %cst_39 : f32 to vector<64x128xf32>
    %cst_40 = arith.constant 0.000000e+00 : f32
    %108 = vector.broadcast %cst_40 : f32 to vector<1x128xf32>
    %cst_41 = arith.constant dense<0x7F800000> : vector<128xf32>
    %109 = vector.multi_reduction <minimumf>, %106, %cst_41 [0] : vector<64x128xf32> to vector<128xf32>
    %110 = vector.shape_cast %109 : vector<128xf32> to vector<1x128xf32>
    %111 = vector.broadcast %110 : vector<1x128xf32> to vector<64x128xf32>
    %112 = arith.cmpf oeq, %106, %111 : vector<64x128xf32>
    %c64_i32_42 = arith.constant 64 : i32
    %113 = vector.broadcast %c64_i32_42 : i32 to vector<64x128xi32>
    %114 = arith.select %112, %10, %113 : vector<64x128xi1>, vector<64x128xi32>
    %cst_43 = arith.constant dense<2147483647> : vector<128xi32>
    %115 = vector.multi_reduction <minsi>, %114, %cst_43 [0] : vector<64x128xi32> to vector<128xi32>
    %116 = vector.shape_cast %115 : vector<128xi32> to vector<1x128xi32>
    %117 = vector.broadcast %116 : vector<1x128xi32> to vector<64x128xi32>
    %118 = arith.cmpi eq, %10, %117 : vector<64x128xi32>
    %cst_44 = arith.constant 9.99999993E-9 : f32
    %119 = vector.broadcast %cst_44 : f32 to vector<1x128xf32>
    %120 = arith.addf %110, %119 : vector<1x128xf32>
    %cst_45 = arith.constant 1.000000e+00 : f32
    %121 = vector.broadcast %cst_45 : f32 to vector<1x128xf32>
    %122 = arith.divf %121, %120 : vector<1x128xf32>
    %123 = vector.shape_cast %122 : vector<1x128xf32> to vector<1x128xf32>
    %124 = vector.broadcast %123 : vector<1x128xf32> to vector<64x128xf32>
    %125 = arith.select %118, %124, %107 : vector<64x128xi1>, vector<64x128xf32>
    %126 = arith.addf %108, %122 : vector<1x128xf32>
    %cst_46 = arith.constant 0x7F800000 : f32
    %127 = vector.broadcast %cst_46 : f32 to vector<64x128xf32>
    %128 = arith.select %118, %127, %106 : vector<64x128xi1>, vector<64x128xf32>
    %cst_47 = arith.constant dense<0x7F800000> : vector<128xf32>
    %129 = vector.multi_reduction <minimumf>, %128, %cst_47 [0] : vector<64x128xf32> to vector<128xf32>
    %130 = vector.shape_cast %129 : vector<128xf32> to vector<1x128xf32>
    %131 = vector.broadcast %130 : vector<1x128xf32> to vector<64x128xf32>
    %132 = arith.cmpf oeq, %128, %131 : vector<64x128xf32>
    %c64_i32_48 = arith.constant 64 : i32
    %133 = vector.broadcast %c64_i32_48 : i32 to vector<64x128xi32>
    %134 = arith.select %132, %10, %133 : vector<64x128xi1>, vector<64x128xi32>
    %cst_49 = arith.constant dense<2147483647> : vector<128xi32>
    %135 = vector.multi_reduction <minsi>, %134, %cst_49 [0] : vector<64x128xi32> to vector<128xi32>
    %136 = vector.shape_cast %135 : vector<128xi32> to vector<1x128xi32>
    %137 = vector.broadcast %136 : vector<1x128xi32> to vector<64x128xi32>
    %138 = arith.cmpi eq, %10, %137 : vector<64x128xi32>
    %cst_50 = arith.constant 9.99999993E-9 : f32
    %139 = vector.broadcast %cst_50 : f32 to vector<1x128xf32>
    %140 = arith.addf %130, %139 : vector<1x128xf32>
    %cst_51 = arith.constant 1.000000e+00 : f32
    %141 = vector.broadcast %cst_51 : f32 to vector<1x128xf32>
    %142 = arith.divf %141, %140 : vector<1x128xf32>
    %143 = vector.shape_cast %142 : vector<1x128xf32> to vector<1x128xf32>
    %144 = vector.broadcast %143 : vector<1x128xf32> to vector<64x128xf32>
    %145 = arith.select %138, %144, %125 : vector<64x128xi1>, vector<64x128xf32>
    %146 = arith.addf %126, %142 : vector<1x128xf32>
    %cst_52 = arith.constant 0x7F800000 : f32
    %147 = vector.broadcast %cst_52 : f32 to vector<64x128xf32>
    %148 = arith.select %138, %147, %128 : vector<64x128xi1>, vector<64x128xf32>
    %cst_53 = arith.constant dense<0x7F800000> : vector<128xf32>
    %149 = vector.multi_reduction <minimumf>, %148, %cst_53 [0] : vector<64x128xf32> to vector<128xf32>
    %150 = vector.shape_cast %149 : vector<128xf32> to vector<1x128xf32>
    %151 = vector.broadcast %150 : vector<1x128xf32> to vector<64x128xf32>
    %152 = arith.cmpf oeq, %148, %151 : vector<64x128xf32>
    %c64_i32_54 = arith.constant 64 : i32
    %153 = vector.broadcast %c64_i32_54 : i32 to vector<64x128xi32>
    %154 = arith.select %152, %10, %153 : vector<64x128xi1>, vector<64x128xi32>
    %cst_55 = arith.constant dense<2147483647> : vector<128xi32>
    %155 = vector.multi_reduction <minsi>, %154, %cst_55 [0] : vector<64x128xi32> to vector<128xi32>
    %156 = vector.shape_cast %155 : vector<128xi32> to vector<1x128xi32>
    %157 = vector.broadcast %156 : vector<1x128xi32> to vector<64x128xi32>
    %158 = arith.cmpi eq, %10, %157 : vector<64x128xi32>
    %cst_56 = arith.constant 9.99999993E-9 : f32
    %159 = vector.broadcast %cst_56 : f32 to vector<1x128xf32>
    %160 = arith.addf %150, %159 : vector<1x128xf32>
    %cst_57 = arith.constant 1.000000e+00 : f32
    %161 = vector.broadcast %cst_57 : f32 to vector<1x128xf32>
    %162 = arith.divf %161, %160 : vector<1x128xf32>
    %163 = vector.shape_cast %162 : vector<1x128xf32> to vector<1x128xf32>
    %164 = vector.broadcast %163 : vector<1x128xf32> to vector<64x128xf32>
    %165 = arith.select %158, %164, %145 : vector<64x128xi1>, vector<64x128xf32>
    %166 = arith.addf %146, %162 : vector<1x128xf32>
    %cst_58 = arith.constant dense<0.000000e+00> : vector<16x128xf32>
    %167 = tpu.matmul %3, %165, %cst_58 {dimension_numbers = #tpu.dot_dimension_numbers<[1], [0], [0], [1], [0, 0, 1, 1], [], []>} : vector<16x64xf32>, vector<64x128xf32>, vector<16x128xf32> -> vector<16x128xf32>
    %168 = tpu.reciprocal %166 : vector<1x128xf32> -> vector<1x128xf32>
    %169 = vector.broadcast %168 : vector<1x128xf32> to vector<16x128xf32>
    %170 = arith.mulf %167, %169 : vector<16x128xf32>
    %c0_59 = arith.constant 0 : index
    %171 = arith.index_cast %93 : i32 to index
    %172 = vector.load %arg12[%c0_59, %171] : memref<16x256xf32, #tpu.memory_space<vmem>>, vector<16x128xf32>
    tpu.vector_store %arg12[%c0_59, %171], %170 {strides = array<i32>} : memref<16x256xf32, #tpu.memory_space<vmem>>, vector<16x128xf32>,
    %c2_i32 = arith.constant 2 : i32
    %c0_60 = arith.constant 0 : index
    %c0_61 = arith.constant 0 : index
    %c0_62 = arith.constant 0 : index
    %173 = vector.load %arg4[%c0_60, %c0_61, %c0_62] : memref<1x16x256xf32, #tpu.memory_space<vmem>>, vector<1x16x256xf32>
    %174 = vector.shape_cast %173 : vector<1x16x256xf32> to vector<16x256xf32>
    %c0_63 = arith.constant 0 : index
    %c0_64 = arith.constant 0 : index
    %175 = vector.load %arg12[%c0_63, %c0_64] : memref<16x256xf32, #tpu.memory_space<vmem>>, vector<16x256xf32>
    %c0_65 = arith.constant 0 : index
    %c0_66 = arith.constant 0 : index
    %176 = vector.load %arg6[%c0_65, %c0_66] : memref<64x16xf32, #tpu.memory_space<vmem>>, vector<64x16xf32>
    %cst_67 = arith.constant dense<0.000000e+00> : vector<64x256xf32>
    %177 = tpu.matmul %176, %174, %cst_67 {dimension_numbers = #tpu.dot_dimension_numbers<[1], [0], [0], [1], [0, 0, 1, 1], [], []>} : vector<64x16xf32>, vector<16x256xf32>, vector<64x256xf32> -> vector<64x256xf32>
    %c0_68 = arith.constant 0 : index
    %c0_69 = arith.constant 0 : index
    %178 = vector.load %arg7[%c0_68, %c0_69] : memref<64x16xf32, #tpu.memory_space<vmem>>, vector<64x16xf32>
    %cst_70 = arith.constant dense<0.000000e+00> : vector<64x256xf32>
    %179 = tpu.matmul %178, %175, %cst_70 {dimension_numbers = #tpu.dot_dimension_numbers<[1], [0], [0], [1], [0, 0, 1, 1], [], []>} : vector<64x16xf32>, vector<16x256xf32>, vector<64x256xf32> -> vector<64x256xf32>
    %180 = arith.addf %177, %179 : vector<64x256xf32>
    %c0_71 = arith.constant 0 : index
    %c0_72 = arith.constant 0 : index
    %181 = vector.load %arg8[%c0_71, %c0_72] : memref<64x1xf32, #tpu.memory_space<vmem>>, vector<64x1xf32>
    %182 = vector.broadcast %181 : vector<64x1xf32> to vector<64x256xf32>
    %183 = arith.addf %180, %182 : vector<64x256xf32>
    %cst_73 = arith.constant 0.000000e+00 : f32
    %184 = vector.broadcast %cst_73 : f32 to vector<64x256xf32>
    %185 = arith.maximumf %183, %184 : vector<64x256xf32>
    %c0_74 = arith.constant 0 : index
    %c0_75 = arith.constant 0 : index
    %186 = vector.load %arg9[%c0_74, %c0_75] : memref<64x64xf32, #tpu.memory_space<vmem>>, vector<64x64xf32>
    %c0_76 = arith.constant 0 : index
    %c0_77 = arith.constant 0 : index
    %187 = vector.load %arg10[%c0_76, %c0_77] : memref<64x1xf32, #tpu.memory_space<vmem>>, vector<64x1xf32>
    %cst_78 = arith.constant dense<0.000000e+00> : vector<64x256xf32>
    %188 = tpu.matmul %186, %185, %cst_78 {dimension_numbers = #tpu.dot_dimension_numbers<[1], [0], [0], [1], [0, 0, 1, 1], [], []>} : vector<64x64xf32>, vector<64x256xf32>, vector<64x256xf32> -> vector<64x256xf32>
    %189 = vector.broadcast %187 : vector<64x1xf32> to vector<64x256xf32>
    %190 = arith.addf %188, %189 : vector<64x256xf32>
    %cst_79 = arith.constant 0.000000e+00 : f32
    %191 = vector.broadcast %cst_79 : f32 to vector<64x256xf32>
    %192 = arith.maximumf %190, %191 : vector<64x256xf32>
    %c0_80 = arith.constant 0 : index
    %c0_81 = arith.constant 0 : index
    %c0_82 = arith.constant 0 : index
    %193 = vector.load %arg11[%c0_80, %c0_81, %c0_82] : memref<1x64x256xf32, #tpu.memory_space<vmem>>, vector<1x64x256xf32>
    %194 = vector.shape_cast %193 : vector<1x64x256xf32> to vector<64x256xf32>
    %195 = vector.shape_cast %192 : vector<64x256xf32> to vector<1x64x256xf32>
    tpu.vector_store %arg11[%c0_80, %c0_81, %c0_82], %195 {strides = array<i32>} : memref<1x64x256xf32, #tpu.memory_space<vmem>>, vector<1x64x256xf32>,
    return
  }
  func.func @transform_0(%arg0: i32, %arg1: i32) -> (i32, i32, i32) {
    %c0_i32 = arith.constant 0 : i32
    %c0_i32_0 = arith.constant 0 : i32
    return %arg0, %c0_i32, %arg1 : i32, i32, i32
  }
  func.func @transform_1(%arg0: i32, %arg1: i32) -> (i32, i32, i32) {
    %c0_i32 = arith.constant 0 : i32
    %c0_i32_0 = arith.constant 0 : i32
    %c0_i32_1 = arith.constant 0 : i32
    return %arg0, %c0_i32, %c0_i32_0 : i32, i32, i32
  }
  func.func @transform_2(%arg0: i32, %arg1: i32) -> (i32, i32, i32) {
    %c0_i32 = arith.constant 0 : i32
    %c0_i32_0 = arith.constant 0 : i32
    return %arg0, %c0_i32, %arg1 : i32, i32, i32
  }
  func.func @transform_3(%arg0: i32, %arg1: i32) -> (i32, i32, i32) {
    %c0_i32 = arith.constant 0 : i32
    %c0_i32_0 = arith.constant 0 : i32
    %c0_i32_1 = arith.constant 0 : i32
    return %arg0, %c0_i32, %c0_i32_0 : i32, i32, i32
  }
  func.func @transform_4(%arg0: i32, %arg1: i32) -> (i32, i32) {
    %c0_i32 = arith.constant 0 : i32
    %c0_i32_0 = arith.constant 0 : i32
    %c0_i32_1 = arith.constant 0 : i32
    return %c0_i32, %c0_i32_0 : i32, i32
  }
  func.func @transform_5(%arg0: i32, %arg1: i32) -> (i32, i32) {
    %c0_i32 = arith.constant 0 : i32
    %c0_i32_0 = arith.constant 0 : i32
    %c0_i32_1 = arith.constant 0 : i32
    return %c0_i32, %c0_i32_0 : i32, i32
  }
  func.func @transform_6(%arg0: i32, %arg1: i32) -> (i32, i32) {
    %c0_i32 = arith.constant 0 : i32
    %c0_i32_0 = arith.constant 0 : i32
    %c0_i32_1 = arith.constant 0 : i32
    return %c0_i32, %c0_i32_0 : i32, i32
  }
  func.func @transform_7(%arg0: i32, %arg1: i32) -> (i32, i32) {
    %c0_i32 = arith.constant 0 : i32
    %c0_i32_0 = arith.constant 0 : i32
    %c0_i32_1 = arith.constant 0 : i32
    return %c0_i32, %c0_i32_0 : i32, i32
  }
  func.func @transform_8(%arg0: i32, %arg1: i32) -> (i32, i32) {
    %c0_i32 = arith.constant 0 : i32
    %c0_i32_0 = arith.constant 0 : i32
    %c0_i32_1 = arith.constant 0 : i32
    return %c0_i32, %c0_i32_0 : i32, i32
  }
  func.func @transform_9(%arg0: i32, %arg1: i32) -> (i32, i32, i32) {
    %c0_i32 = arith.constant 0 : i32
    %c0_i32_0 = arith.constant 0 : i32
    return %arg0, %c0_i32, %arg1 : i32, i32, i32
  }
}

</mosaic_0001>

<bundles_post_ra>
// kernel: tpu_custom_call.1
= control target key start
LH: loop header
LB: loop body
LE: loop exit
PB: predicated region body
PF: predicated region fallthrough
CT: control target
= control target key end

     0   :  { %14 = vsyncpa [#allocation4], 0  ;;  %s3454_s0 = inlined_call_operand.vmem [shape: f32[2,3,256], index: 0, kind: input, shape index: {}]   ;;  %s3455_s1 = inlined_call_operand.vmem [shape: f32[2,3,64], index: 1, kind: input, shape index: {}]   ;;  %s3456_s2 = inlined_call_operand.vmem [shape: f32[2,16,256], index: 2, kind: input, shape index: {}]   ;;  %s3457_s3 = inlined_call_operand.vmem [shape: f32[2,16,64], index: 3, kind: input, shape index: {}]   ;;  %s3458_s4 = inlined_call_operand.vmem [shape: f32[64,16], index: 4, kind: input, shape index: {}]   ;;  %s3459_s5 = inlined_call_operand.vmem [shape: f32[64,16], index: 5, kind: input, shape index: {}]   ;;  %s3460_s6 = inlined_call_operand.vmem [shape: f32[64,1], index: 6, kind: input, shape index: {}]   ;;  %s3461_s7 = inlined_call_operand.vmem [shape: f32[64,64], index: 7, kind: input, shape index: {}]   ;;  %s3462_s8 = inlined_call_operand.vmem [shape: f32[64,1], index: 8, kind: input, shape index: {}]   ;;  %s3463_s9 = inlined_call_operand.hbm [shape: f32[2,64,256], index: 9, kind: output, shape index: {}]  }
   0x1   :  { %16 = vsyncpa [#allocation4 + $0x1], 0  ;;  %s2526_s30 = smov 0   ;;  %s2528_s10 = smov 0  }
   0x2   :  { %s2530_s11 = smov 0   ;;  %s2532_s12 = smov 0  }
   0x3   :  { %s2534_s13 = smov 0   ;;  %s2536_s14 = smov 0  }
   0x4 LB: > { %s2143_s15 = sadd.s32 4294967295, %s2469_s14   ;;  %s2144_s16 = sadd.s32 4294967294, %s2469_s14   ;;  %s2469_s14 = sphi %s2536_s14, %s22_s14   ;;  %s2465_s13 = sphi %s2534_s13, %s3488_s13   ;;  %s2461_s12 = sphi %s2532_s12, %s3487_s12   ;;  %s2457_s11 = sphi %s2530_s11, %s3486_s11   ;;  %s2453_s10 = sphi %s2528_s10, %s3485_s10   ;;  %s2449_s30 = sphi %s2526_s30, %s3484_s30  }
   0x5   : > { %s34_s17 = sadd.s32 1, %s2465_s13  ;;  %s256_s18 = sadd.s32 1, %s2457_s11 }
   0x6   : > { %p36_p0 = scmp.ge.s32.totalorder %s34_s17, 2  ;;  %p266_p1 = scmp.ne.s32.totalorder %s2457_s11, %s2453_s10 }
   0x7   : > { %p267_p2 = scmp.eq.s32.totalorder %s2143_s15, 1  ;;  %p272_p3 = scmp.ne.s32.totalorder %s2453_s10, %s2449_s30 }
   0x8   : > { %s3490_s17 = smov (%p36_p0, %s34_s17), 0  ;;  %p273_p5 = scmp.eq.s32.totalorder %s2144_s16, 1 }
   0x9   : > { %p2566_p4 = por %p267_p2, %p266_p1  ;;  %s251_s20 = ssub.s32 %s2465_s13, %s3490_s17 }
   0xa   : > { %p2147_p6 = scmp.ge.s32.totalorder %s2469_s14, 1  ;;  %p254_p7 = scmp.eq.s32.totalorder %s251_s20, 0 }
   0xb   : > { %p2573_p8 = por %p273_p5, %p272_p3  ;;  %p347_p9 = scmp.lt.s32.totalorder %s2469_s14, 3 }
   0xc   : > { %s2579_s22 = scalar_select %p254_p7, %s2457_s11, %s256_s18  }
   0xd   : > { %p348_p10 = pnand %p2147_p6, %p347_p9 }
   0xe   : > { %p406_p11 = scmp.lt.s32.totalorder (!%p348_p10), %s2461_s12, 1 }
   0xf   : > { %351 = sbr.rel (%p348_p10) target bundleno = 1588 (0x634), region = 56 }
  0x14   : > { %s2583_s23 = scalar_select %p406_p11, %s2461_s12, 1  ;;  %vm439_vm0 = vcmask 518144   ;;  %vm448_vm1 = vcmask 1042432   ;;  %vm526_vm2 = vcmask 1043456   ;;  %vm501_vm3 = vcmask 31744  }
  0x15   : > { %v450_v61 = vlaneseq }
  0x16   : > { %s2151_s24 = sshll.u32 %s2583_s23, 2  ;;  %s2208_s28 = sshll.u32 %s2583_s23, 3 }
  0x17   : > { %s418_s27 = scalar_lea.vmem %s3455_s1, %s2151_s24  ;;  %s2593_s16 = scalar_lea.vmem %s3454_s0, %s2208_s28 }
  0x18   : > { %v435_v0 = vld [vmem:[%s418_s27] sm:$0x7]  ;;  %s2210_s18 = sshll.u32 %s2583_s23, 4  ;;  %s2209_s26 = sshll.u32 %s2583_s23, 5 }
  0x19   : > { %v438_v1 = vmul.f32 %v435_v0, %v435_v0  ;;  %v447_v8 = vmul.f32 -2.0, %v435_v0  ;;  %v459_v10 = vld [vmem:[%s2593_s16] sm:$0x7]  ;;  %v2657_v0 = vshrl.u32 %v450_v61, 7  ;;  %s2696_s25 = scalar_lea.vmem %s3457_s3, %s2210_s18  ;;  %s427_s29 = scalar_lea.vmem %s3456_s2, %s2209_s26 }
  0x1a   : > { %v468_v11 = vsel %vm448_vm1, %v459_v10, 1.0  ;;  %v460_v21 = vmul.f32 %v459_v10, %v459_v10  ;;  %s402_s18 = sand.u32 1, %s2453_s10  }
  0x1b   : > { %v440_v2 = vsel %vm439_vm0, %v438_v1, 0.0  ;;  %2250 = vmatprep.subr.msk.mxu1 %vm526_vm2, %v468_v11  ;;  %v2678_v10 = vadd.s32 56, %v2657_v0  ;;  %s2148_s20 = sshll.u32 %s402_s18, 7 }
  0x1c   : > { %v441_v3 = vrot.slane %v440_v2, 4  ;;  %2251 = vmatpush3.msk.msra.mxu1 %vm526_vm2, %v468_v11  ;;  %v461_v22 = vsel %vm448_vm1, %v460_v21, 0.0  ;;  %s3380_s24 = scalar_lea.vmem [#allocation3], %s2148_s20 }
  0x1d   : > { %v462_v23 = vrot.slane %v461_v22, 4  ;;  %s2022_s26 = sshll.u32 %s3380_s24, 4  ;;  %s3403_s26 = int_to_ptr.vmem [resolvable:$true] %s2022_s26 }
  0x1e   : > { %v442_v4 = vadd.f32 %v441_v3, %v440_v2  ;;  %v2660_v3 = vadd.s32 8, %v2657_v0  ;;  %s2393_s15 = scalar_lea.vmem %s3403_s26, 2048 }
  0x1f   : > { %v463_v24 = vadd.f32 %v462_v23, %v461_v22  ;;  %p2394_p12 = scmp.ne.s32.totalorder %s3403_s26, %s2393_s15 }
  0x20   : > { %v443_v5 = vrot.slane %v442_v4, 2 }
  0x21   : > { %v464_v26 = vrot.slane %v463_v24, 2  ;;  %p2395_p13 = pnand %p2394_p12, %p2566_p4 }
  0x22   : > { %v444_v6 = vadd.f32 %v443_v5, %v442_v4  ;;  %v2663_v4 = vadd.s32 16, %v2657_v0  ;;  %v2666_v5 = vadd.s32 24, %v2657_v0 }
  0x23   : > { %v465_v29 = vadd.f32 %v464_v26, %v463_v24  ;;  %p2396_p0 = pneg %p2395_p13 }
  0x24   : > { %v445_v7 = vrot.slane %v444_v6, 1 }
  0x25   : > { %v466_v31 = vrot.slane %v465_v29, 1 }
  0x26   : > { %v446_v9 = vadd.f32 %v445_v7, %v444_v6  ;;  %v2669_v7 = vadd.s32 32, %v2657_v0 }
  0x27   : > { %v467_v34 = vadd.f32 %v466_v31, %v465_v29 }
  0x28   : > { %v449_v12 = vsel %vm448_vm1, %v447_v8, %v446_v9  ;;  %v2672_v8 = vadd.s32 40, %v2657_v0  ;;  %v2675_v9 = vadd.s32 48, %v2657_v0 }
  0x29   : > { %469 = vxpose.xlu0.b32.start.end [1/1] (short) (narrow) %v449_v12, 64 }
  0xa5   : > { %v2600_v13 = vpop.trf.xlu0 }
  0xa6   : > { %2252 = vmatprep.mubr.msk.f32.mxu1 %vm501_vm3, %v2600_v13 }
  0xa9   : > { %v2604_v14 = vpop.trf.xlu0 }
  0xaa   : > { %2253 = vmatmul.mubr.msk.f32.vlgmr.msra.gmra.mxu1 %vm501_vm3, %v2604_v14 }
  0xad   : > { %v2608_v15 = vpop.trf.xlu0 }
  0xae   : > { %2255 = vmatprep.mubr.msk.f32.mxu1 %vm501_vm3, %v2608_v15 }
  0xb1   : > { %v2612_v16 = vpop.trf.xlu0 }
  0xb2   : > { %2256 = vmatmul.mubr.msk.f32.gmra.mxu1 %vm501_vm3, %v2612_v16 }
  0xb5   : > { %v2616_v17 = vpop.trf.xlu0 }
  0xb6   : > { %2258 = vmatprep.mubr.msk.f32.mxu1 %vm501_vm3, %v2616_v17 }
  0xb9   : > { %v2620_v18 = vpop.trf.xlu0 }
  0xba   : > { %2259 = vmatmul.mubr.msk.f32.gmra.mxu1 %vm501_vm3, %v2620_v18 }
  0xbd   : > { %v2624_v19 = vpop.trf.xlu0 }
  0xbe   : > { %2261 = vmatprep.mubr.msk.f32.mxu1 %vm501_vm3, %v2624_v19 }
  0xc1   : > { %v2628_v20 = vpop.trf.xlu0 }
  0xc2   : > { %2262 = vmatmul.mubr.msk.f32.gmra.mxu1 %vm501_vm3, %v2628_v20 }
 0x16a   : > { %v2254_v25 = vpop.f32.mrf.mxu1 }
 0x16b   : > { %v602_v38 = vadd.f32 %v2254_v25, %v467_v34 }
 0x16c   : > { %v596_v27 = vpop.f32.mrf.mxu1 }
 0x16d   : > { %v597_v36 = vadd.f32 %v596_v27, %v467_v34  ;;  %v2641_v49 = vmax.f32 %v602_v38, 0.0  ;;  %v2703_v27 = vld [vmem:[%s2696_s25] sm:$0xff] }
 0x16f   : > { %v2635_v45 = vmax.f32 %v597_v36, 0.0 }
 0x172   : > { %v2257_v28 = vpop.f32.mrf.mxu1 }
 0x173   : > { %v612_v40 = vadd.f32 %v2257_v28, %v467_v34 }
 0x174   : > { %v606_v30 = vpop.f32.mrf.mxu1 }
 0x175   : > { %v607_v41 = vadd.f32 %v606_v30, %v467_v34  ;;  %v2643_v50 = vmax.f32 %v612_v40, 0.0 }
 0x177   : > { %v2645_v51 = vmax.f32 %v607_v41, 0.0 }
 0x17a   : > { %v2260_v32 = vpop.f32.mrf.mxu1 }
 0x17b   : > { %v622_v37 = vadd.f32 %v2260_v32, %v467_v34 }
 0x17c   : > { %v616_v33 = vpop.f32.mrf.mxu1 }
 0x17d   : > { %v617_v35 = vadd.f32 %v616_v33, %v467_v34  ;;  %v2637_v46 = vmax.f32 %v622_v37, 0.0 }
 0x17f   : > { %v2633_v42 = vmax.f32 %v617_v35, 0.0  ;;  %v644_v54 = vmin.f32 %v2641_v49, %v2637_v46 }
 0x181   : > { %v643_v52 = vmin.f32 %v2635_v45, %v2633_v42 }
 0x182   : > { %v2263_v39 = vpop.f32.mrf.mxu1 }
 0x183   : > { %v632_v43 = vadd.f32 %v2263_v39, %v467_v34  ;;  %v647_v57 = vmin.f32 %v643_v52, %v644_v54 }
 0x184   : > { %v626_v44 = vpop.f32.mrf.mxu1 }
 0x185   : > { %v2639_v47 = vmax.f32 %v632_v43, 0.0  ;;  %v627_v48 = vadd.f32 %v626_v44, %v467_v34 }
 0x187   : > { %v2649_v53 = vmax.f32 %v627_v48, 0.0  ;;  %v646_v55 = vmin.f32 %v2643_v50, %v2639_v47 }
 0x189   : > { %v645_v56 = vmin.f32 %v2645_v51, %v2649_v53 }
 0x18b   : > { %v648_v58 = vmin.f32 %v645_v56, %v646_v55 }
 0x18d   : > { %v649_v59 = vmin.f32 %v647_v57, %v648_v58 }
 0x18f   : > { %v650_v60 = vrot.slane %v649_v59, 4 }
 0x191   : > { %v651_v62 = vmin.f32 %v649_v59, %v650_v60 }
 0x193   : > { %v652_v63 = vrot.slane %v651_v62, 2 }
 0x195   : > { %v653_v1 = vmin.f32 %v651_v62, %v652_v63 }
 0x197   : > { %v654_v2 = vrot.slane %v653_v1, 1 }
 0x199   : > { %v655_v6 = vmin.f32 %v653_v1, %v654_v2 }
 0x19b   : > { %vm656_vm4 = vcmp.eq.f32.partialorder %v2635_v45, %v655_v6  ;;  %vm657_vm5 = vcmp.eq.f32.partialorder %v2641_v49, %v655_v6  ;;  %vm658_vm6 = vcmp.eq.f32.partialorder %v2645_v51, %v655_v6  ;;  %vm659_vm7 = vcmp.eq.f32.partialorder %v2643_v50, %v655_v6 }
 0x19c   : > { %vm660_vm8 = vcmp.eq.f32.partialorder %v2633_v42, %v655_v6  ;;  %vm661_vm9 = vcmp.eq.f32.partialorder %v2637_v46, %v655_v6  ;;  %vm662_vm10 = vcmp.eq.f32.partialorder %v2649_v53, %v655_v6  ;;  %vm663_vm11 = vcmp.eq.f32.partialorder %v2639_v47, %v655_v6 }
 0x19d   : > { %v664_v11 = vsel %vm656_vm4, %v2657_v0, 64  ;;  %v665_v12 = vsel %vm657_vm5, %v2660_v3, 64  ;;  %v666_v21 = vsel %vm658_vm6, %v2663_v4, 64  ;;  %v667_v22 = vsel %vm659_vm7, %v2666_v5, 64 }
 0x19e   : > { %v668_v23 = vsel %vm660_vm8, %v2669_v7, 64  ;;  %v669_v24 = vsel %vm661_vm9, %v2672_v8, 64  ;;  %v670_v25 = vsel %vm662_vm10, %v2675_v9, 64  ;;  %v671_v26 = vsel %vm663_vm11, %v2678_v10, 64 }
 0x19f   : > { %vm672_vm12 = vcmp.lt.s32.totalorder %v664_v11, %v668_v23  ;;  %vm674_vm13 = vcmp.lt.s32.totalorder %v665_v12, %v669_v24  ;;  %vm676_vm14 = vcmp.lt.s32.totalorder %v666_v21, %v670_v25  ;;  %vm678_vm15 = vcmp.lt.s32.totalorder %v667_v22, %v671_v26 }
 0x1a0   : > { %v673_v28 = vsel %vm672_vm12, %v664_v11, %v668_v23  ;;  %v675_v29 = vsel %vm674_vm13, %v665_v12, %v669_v24  ;;  %v677_v30 = vsel %vm676_vm14, %v666_v21, %v670_v25  ;;  %v679_v31 = vsel %vm678_vm15, %v667_v22, %v671_v26 }
 0x1a1   : > { %vm680_vm0 = vcmp.lt.s32.totalorder %v673_v28, %v675_v29  ;;  %vm682_vm4 = vcmp.lt.s32.totalorder %v677_v30, %v679_v31  ;;  %vm3464_vm5 = vcmask 523264   ;;  %v703_v34 = vadd.f32 1e-08, %v655_v6 }
 0x1a2   : > { %v681_v32 = vsel %vm680_vm0, %v673_v28, %v675_v29  ;;  %v683_v33 = vsel %vm682_vm4, %v677_v30, %v679_v31  ;;  %2280 = vmatprep.mubr.msk.f32.mxu1 %vm3464_vm5, %v2703_v27 }
 0x1a3   : > { %vm684_vm6 = vcmp.lt.s32.totalorder %v681_v32, %v683_v33  ;;  %2377 = vrcp.f32 %v703_v34 }
 0x1a4   : > { %v685_v35 = vsel %vm684_vm6, %v681_v32, %v683_v33 }
 0x1a5   : > { %v686_v36 = vrot.slane %v685_v35, 4 }
 0x1a7   : > { %vm687_vm7 = vcmp.lt.s32.totalorder %v685_v35, %v686_v36 }
 0x1a8   : > { %v688_v37 = vsel %vm687_vm7, %v685_v35, %v686_v36 }
 0x1a9   : > { %v689_v38 = vrot.slane %v688_v37, 2 }
 0x1ab   : > { %vm690_vm8 = vcmp.lt.s32.totalorder %v688_v37, %v689_v38 }
 0x1ac   : > { %v691_v39 = vsel %vm690_vm8, %v688_v37, %v689_v38 }
 0x1ad   : > { %v692_v40 = vrot.slane %v691_v39, 1 }
 0x1af   : > { %vm693_vm9 = vcmp.lt.s32.totalorder %v691_v39, %v692_v40 }
 0x1b0   : > { %v694_v41 = vsel %vm693_vm9, %v691_v39, %v692_v40  ;;  %v2723_v48 = vpop.eup %2377 }
 0x1b1   : > { %vm697_vm10 = vcmp.eq.s32.totalorder %v2663_v4, %v694_v41  ;;  %vm701_vm11 = vcmp.eq.s32.totalorder %v2675_v9, %v694_v41  ;;  %vm695_vm12 = vcmp.eq.s32.totalorder %v2657_v0, %v694_v41  ;;  %vm696_vm13 = vcmp.eq.s32.totalorder %v2660_v3, %v694_v41 }
 0x1b2   : > { %v2714_v43 = vsel %vm697_vm10, inf, %v2645_v51  ;;  %v2719_v44 = vsel %vm701_vm11, inf, %v2649_v53  ;;  %vm698_vm14 = vcmp.eq.s32.totalorder %v2666_v5, %v694_v41  ;;  %vm699_vm15 = vcmp.eq.s32.totalorder %v2669_v7, %v694_v41 }
 0x1b3   : > { %v725_v52 = vmin.f32 %v2714_v43, %v2719_v44  ;;  %vm700_vm0 = vcmp.eq.s32.totalorder %v2672_v8, %v694_v41  ;;  %vm702_vm4 = vcmp.eq.s32.totalorder %v2678_v10, %v694_v41  ;;  %v2732_v51 = vsel %vm695_vm12, inf, %v2635_v45 }
 0x1b4   : > { %v2735_v53 = vsel %vm702_vm4, %v2723_v48, 0.0  ;;  %v2740_v54 = vsel %vm696_vm13, inf, %v2641_v49  ;;  %v2745_v55 = vsel %vm698_vm14, inf, %v2643_v50  ;;  %v2750_v56 = vsel %vm699_vm15, inf, %v2633_v42 }
 0x1b5   : > { %v2753_v45 = vsel %vm700_vm0, inf, %v2637_v46  ;;  %v2756_v57 = vsel %vm702_vm4, inf, %v2639_v47  ;;  %v723_v49 = vmin.f32 %v2732_v51, %v2750_v56  ;;  %v2763_v58 = vsel %vm701_vm11, %v2723_v48, 0.0 }
 0x1b6   : > { %v724_v50 = vmin.f32 %v2740_v54, %v2753_v45  ;;  %v726_v42 = vmin.f32 %v2745_v55, %v2756_v57  ;;  %v2770_v46 = vsel %vm700_vm0, %v2723_v48, 0.0  ;;  %v2775_v47 = vsel %vm699_vm15, %v2723_v48, 0.0 }
 0x1b7   : > { %v2780_v59 = vsel %vm698_vm14, %v2723_v48, 0.0  ;;  %v2785_v60 = vsel %vm697_vm10, %v2723_v48, 0.0  ;;  %v2790_v61 = vsel %vm696_vm13, %v2723_v48, 0.0  ;;  %v2795_v62 = vsel %vm695_vm12, %v2723_v48, 0.0 }
 0x1b8   : > { %v727_v63 = vmin.f32 %v723_v49, %v724_v50  ;;  %v728_v1 = vmin.f32 %v725_v52, %v726_v42 }
 0x1ba   : > { %v729_v2 = vmin.f32 %v727_v63, %v728_v1 }
 0x1bc   : > { %v730_v6 = vrot.slane %v729_v2, 4 }
 0x1be   : > { %v731_v11 = vmin.f32 %v729_v2, %v730_v6 }
 0x1c0   : > { %v732_v12 = vrot.slane %v731_v11, 2 }
 0x1c2   : > { %v733_v21 = vmin.f32 %v731_v11, %v732_v12 }
 0x1c4   : > { %v734_v22 = vrot.slane %v733_v21, 1 }
 0x1c6   : > { %v735_v23 = vmin.f32 %v733_v21, %v734_v22 }
 0x1c8   : > { %vm736_vm6 = vcmp.eq.f32.partialorder %v2732_v51, %v735_v23  ;;  %vm737_vm7 = vcmp.eq.f32.partialorder %v2740_v54, %v735_v23  ;;  %vm738_vm8 = vcmp.eq.f32.partialorder %v2714_v43, %v735_v23  ;;  %vm739_vm9 = vcmp.eq.f32.partialorder %v2745_v55, %v735_v23 }
 0x1c9   : > { %vm740_vm10 = vcmp.eq.f32.partialorder %v2750_v56, %v735_v23  ;;  %vm741_vm11 = vcmp.eq.f32.partialorder %v2753_v45, %v735_v23  ;;  %vm742_vm12 = vcmp.eq.f32.partialorder %v2719_v44, %v735_v23  ;;  %vm743_vm13 = vcmp.eq.f32.partialorder %v2756_v57, %v735_v23 }
 0x1ca   : > { %v744_v24 = vsel %vm736_vm6, %v2657_v0, 64  ;;  %v745_v25 = vsel %vm737_vm7, %v2660_v3, 64  ;;  %v746_v26 = vsel %vm738_vm8, %v2663_v4, 64  ;;  %v747_v28 = vsel %vm739_vm9, %v2666_v5, 64 }
 0x1cb   : > { %v748_v29 = vsel %vm740_vm10, %v2669_v7, 64  ;;  %v749_v30 = vsel %vm741_vm11, %v2672_v8, 64  ;;  %v750_v31 = vsel %vm742_vm12, %v2675_v9, 64  ;;  %v751_v32 = vsel %vm743_vm13, %v2678_v10, 64 }
 0x1cc   : > { %vm752_vm14 = vcmp.lt.s32.totalorder %v744_v24, %v748_v29  ;;  %vm754_vm15 = vcmp.lt.s32.totalorder %v745_v25, %v749_v30  ;;  %vm756_vm0 = vcmp.lt.s32.totalorder %v746_v26, %v750_v31  ;;  %vm758_vm4 = vcmp.lt.s32.totalorder %v747_v28, %v751_v32 }
 0x1cd   : > { %v753_v33 = vsel %vm752_vm14, %v744_v24, %v748_v29  ;;  %v755_v34 = vsel %vm754_vm15, %v745_v25, %v749_v30  ;;  %v757_v35 = vsel %vm756_vm0, %v746_v26, %v750_v31  ;;  %v759_v36 = vsel %vm758_vm4, %v747_v28, %v751_v32 }
 0x1ce   : > { %vm760_vm6 = vcmp.lt.s32.totalorder %v753_v33, %v755_v34  ;;  %vm762_vm7 = vcmp.lt.s32.totalorder %v757_v35, %v759_v36  ;;  %v783_v37 = vadd.f32 1e-08, %v735_v23 }
 0x1cf   : > { %v761_v38 = vsel %vm760_vm6, %v753_v33, %v755_v34  ;;  %v763_v39 = vsel %vm762_vm7, %v757_v35, %v759_v36 }
 0x1d0   : > { %vm764_vm8 = vcmp.lt.s32.totalorder %v761_v38, %v763_v39  ;;  %2379 = vrcp.f32 %v783_v37 }
 0x1d1   : > { %v765_v40 = vsel %vm764_vm8, %v761_v38, %v763_v39 }
 0x1d2   : > { %v766_v41 = vrot.slane %v765_v40, 4 }
 0x1d4   : > { %vm767_vm9 = vcmp.lt.s32.totalorder %v765_v40, %v766_v41 }
 0x1d5   : > { %v768_v52 = vsel %vm767_vm9, %v765_v40, %v766_v41 }
 0x1d6   : > { %v769_v49 = vrot.slane %v768_v52, 2 }
 0x1d8   : > { %vm770_vm10 = vcmp.lt.s32.totalorder %v768_v52, %v769_v49 }
 0x1d9   : > { %v771_v50 = vsel %vm770_vm10, %v768_v52, %v769_v49 }
 0x1da   : > { %v772_v42 = vrot.slane %v771_v50, 1 }
 0x1dc   : > { %vm773_vm11 = vcmp.lt.s32.totalorder %v771_v50, %v772_v42 }
 0x1dd   : > { %v774_v63 = vsel %vm773_vm11, %v771_v50, %v772_v42  ;;  %v2380_v1 = vpop.eup %2379 }
 0x1de   : > { %vm775_vm12 = vcmp.eq.s32.totalorder %v2657_v0, %v774_v63  ;;  %vm776_vm13 = vcmp.eq.s32.totalorder %v2660_v3, %v774_v63  ;;  %vm777_vm14 = vcmp.eq.s32.totalorder %v2663_v4, %v774_v63  ;;  %vm778_vm15 = vcmp.eq.s32.totalorder %v2666_v5, %v774_v63 }
 0x1df   : > { %vm779_vm0 = vcmp.eq.s32.totalorder %v2669_v7, %v774_v63  ;;  %vm780_vm4 = vcmp.eq.s32.totalorder %v2672_v8, %v774_v63  ;;  %vm781_vm6 = vcmp.eq.s32.totalorder %v2675_v9, %v774_v63  ;;  %vm782_vm7 = vcmp.eq.s32.totalorder %v2678_v10, %v774_v63 }
 0x1e0   : > { %v2822_v2 = vsel %vm782_vm7, %v2380_v1, %v2735_v53  ;;  %v795_v6 = vsel %vm775_vm12, inf, %v2732_v51  ;;  %v796_v11 = vsel %vm776_vm13, inf, %v2740_v54  ;;  %v797_v12 = vsel %vm777_vm14, inf, %v2714_v43 }
 0x1e1   : > { %v798_v21 = vsel %vm778_vm15, inf, %v2745_v55  ;;  %v799_v53 = vsel %vm779_vm0, inf, %v2750_v56  ;;  %v800_v51 = vsel %vm780_vm4, inf, %v2753_v45  ;;  %v801_v22 = vsel %vm781_vm6, inf, %v2719_v44 }
 0x1e2   : > { %v802_v54 = vsel %vm782_vm7, inf, %v2756_v57  ;;  %v803_v23 = vmin.f32 %v795_v6, %v799_v53  ;;  %v804_v24 = vmin.f32 %v796_v11, %v800_v51  ;;  %v805_v25 = vmin.f32 %v797_v12, %v801_v22 }
 0x1e3   : > { %v806_v43 = vmin.f32 %v798_v21, %v802_v54  ;;  %v2845_v26 = vsel %vm781_vm6, %v2380_v1, %v2763_v58  ;;  %v2850_v55 = vsel %vm780_vm4, %v2380_v1, %v2770_v46  ;;  %v2855_v56 = vsel %vm779_vm0, %v2380_v1, %v2775_v47 }
 0x1e4   : > { %v807_v44 = vmin.f32 %v803_v23, %v804_v24  ;;  %v2860_v45 = vsel %vm778_vm15, %v2380_v1, %v2780_v59  ;;  %v2865_v57 = vsel %vm777_vm14, %v2380_v1, %v2785_v60  ;;  %v2870_v58 = vsel %vm776_vm13, %v2380_v1, %v2790_v61 }
 0x1e5   : > { %v808_v46 = vmin.f32 %v805_v25, %v806_v43  ;;  %v2875_v47 = vsel %vm775_vm12, %v2380_v1, %v2795_v62  ;;  %v2878_v28 = vadd.f32 %v2380_v1, %v2723_v48 }
 0x1e7   : > { %v809_v59 = vmin.f32 %v807_v44, %v808_v46  ;;  %v2907_v44 = vld [vmem:[%s2696_s25 + $0x8] sm:$0xff]  ;;  %s2211_s25 = sshll.u32 %s2461_s12, 11  ;;  %s3409_s12 = scalar_lea.sflag [#allocation4], %s402_s18 }
 0x1e9   : > { %v810_v29 = vrot.slane %v809_v59, 4 }
 0x1eb   : > { %v811_v30 = vmin.f32 %v809_v59, %v810_v29 }
 0x1ed   : > { %v812_v31 = vrot.slane %v811_v30, 2 }
 0x1ef   : > { %v813_v60 = vmin.f32 %v811_v30, %v812_v31 }
 0x1f1   : > { %v814_v32 = vrot.slane %v813_v60, 1 }
 0x1f3   : > { %v815_v33 = vmin.f32 %v813_v60, %v814_v32 }
 0x1f5   : > { %vm816_vm8 = vcmp.eq.f32.partialorder %v795_v6, %v815_v33  ;;  %vm817_vm9 = vcmp.eq.f32.partialorder %v796_v11, %v815_v33  ;;  %vm818_vm10 = vcmp.eq.f32.partialorder %v797_v12, %v815_v33  ;;  %vm819_vm11 = vcmp.eq.f32.partialorder %v798_v21, %v815_v33 }
 0x1f6   : > { %vm820_vm13 = vcmp.eq.f32.partialorder %v799_v53, %v815_v33  ;;  %vm821_vm14 = vcmp.eq.f32.partialorder %v800_v51, %v815_v33  ;;  %vm822_vm15 = vcmp.eq.f32.partialorder %v801_v22, %v815_v33  ;;  %vm823_vm0 = vcmp.eq.f32.partialorder %v802_v54, %v815_v33 }
 0x1f7   : > { %v824_v61 = vsel %vm816_vm8, %v2657_v0, 64  ;;  %v825_v48 = vsel %vm817_vm9, %v2660_v3, 64  ;;  %v826_v62 = vsel %vm818_vm10, %v2663_v4, 64  ;;  %v827_v34 = vsel %vm819_vm11, %v2666_v5, 64 }
 0x1f8   : > { %v828_v35 = vsel %vm820_vm13, %v2669_v7, 64  ;;  %v829_v36 = vsel %vm821_vm14, %v2672_v8, 64  ;;  %v830_v37 = vsel %vm822_vm15, %v2675_v9, 64  ;;  %v831_v38 = vsel %vm823_vm0, %v2678_v10, 64 }
 0x1f9   : > { %vm832_vm12 = vcmp.lt.s32.totalorder %v824_v61, %v828_v35  ;;  %vm834_vm4 = vcmp.lt.s32.totalorder %v825_v48, %v829_v36  ;;  %vm836_vm6 = vcmp.lt.s32.totalorder %v826_v62, %v830_v37  ;;  %vm838_vm7 = vcmp.lt.s32.totalorder %v827_v34, %v831_v38 }
 0x1fa   : > { %v833_v39 = vsel %vm832_vm12, %v824_v61, %v828_v35  ;;  %v835_v40 = vsel %vm834_vm4, %v825_v48, %v829_v36  ;;  %v837_v41 = vsel %vm836_vm6, %v826_v62, %v830_v37  ;;  %v839_v52 = vsel %vm838_vm7, %v827_v34, %v831_v38 }
 0x1fb   : > { %vm840_vm8 = vcmp.lt.s32.totalorder %v833_v39, %v835_v40  ;;  %vm842_vm9 = vcmp.lt.s32.totalorder %v837_v41, %v839_v52  ;;  %v863_v49 = vadd.f32 1e-08, %v815_v33 }
 0x1fc   : > { %v841_v50 = vsel %vm840_vm8, %v833_v39, %v835_v40  ;;  %v843_v42 = vsel %vm842_vm9, %v837_v41, %v839_v52 }
 0x1fd   : > { %vm844_vm10 = vcmp.lt.s32.totalorder %v841_v50, %v843_v42  ;;  %2381 = vrcp.f32 %v863_v49 }
 0x1fe   : > { %v845_v63 = vsel %vm844_vm10, %v841_v50, %v843_v42 }
 0x1ff   : > { %v846_v1 = vrot.slane %v845_v63, 4 }
 0x201   : > { %vm847_vm11 = vcmp.lt.s32.totalorder %v845_v63, %v846_v1 }
 0x202   : > { %v848_v6 = vsel %vm847_vm11, %v845_v63, %v846_v1 }
 0x203   : > { %v849_v11 = vrot.slane %v848_v6, 2 }
 0x205   : > { %vm850_vm13 = vcmp.lt.s32.totalorder %v848_v6, %v849_v11 }
 0x206   : > { %v851_v12 = vsel %vm850_vm13, %v848_v6, %v849_v11 }
 0x207   : > { %v852_v21 = vrot.slane %v851_v12, 1 }
 0x209   : > { %vm853_vm14 = vcmp.lt.s32.totalorder %v851_v12, %v852_v21 }
 0x20a   : > { %v854_v53 = vsel %vm853_vm14, %v851_v12, %v852_v21  ;;  %v2382_v51 = vpop.eup %2381 }
 0x20b   : > { %vm862_vm15 = vcmp.eq.s32.totalorder %v2678_v10, %v854_v53  ;;  %vm861_vm0 = vcmp.eq.s32.totalorder %v2675_v9, %v854_v53  ;;  %vm860_vm12 = vcmp.eq.s32.totalorder %v2672_v8, %v854_v53  ;;  %vm859_vm4 = vcmp.eq.s32.totalorder %v2669_v7, %v854_v53 }
 0x20c   : > { %v873_v22 = vsel %vm862_vm15, %v2382_v51, %v2822_v2  ;;  %v872_v54 = vsel %vm861_vm0, %v2382_v51, %v2845_v26  ;;  %v871_v23 = vsel %vm860_vm12, %v2382_v51, %v2850_v55  ;;  %v870_v24 = vsel %vm859_vm4, %v2382_v51, %v2855_v56  ;;  %v2167_v56 = vld [vmem:[%s2593_s16 + $0x4] sm:$0x7]  ;;  %s2473_s16 = smov [#allocation3]  }
 0x20d   : > { %2264 = vmatprep.subr.mxu1 %v873_v22  ;;  %vm858_vm6 = vcmp.eq.s32.totalorder %v2666_v5, %v854_v53  ;;  %vm857_vm7 = vcmp.eq.s32.totalorder %v2663_v4, %v854_v53  ;;  %vm856_vm8 = vcmp.eq.s32.totalorder %v2660_v3, %v854_v53  ;;  %vm855_vm9 = vcmp.eq.s32.totalorder %v2657_v0, %v854_v53  ;;  %s2397_s23 = sshll.u32 %s2473_s16, 4  ;;  %s2398_s23 = int_to_ptr.vmem [resolvable:$false] %s2397_s23 }
 0x20e   : > { %2265 = vmatpush3.msra.mxu1 %v873_v22  ;;  %v869_v25 = vsel %vm858_vm6, %v2382_v51, %v2860_v45  ;;  %v868_v2 = vsel %vm857_vm7, %v2382_v51, %v2865_v57  ;;  %v867_v43 = vsel %vm856_vm8, %v2382_v51, %v2870_v58  ;;  %v866_v26 = vsel %vm855_vm9, %v2382_v51, %v2875_v47  ;;  %s2399_s20 = scalar_lea.vmem %s2398_s23, 4096  ;;  %p2400_p1 = scmp.lt.s32.totalorder %s3403_s26, %s2398_s23 }
 0x20f   : > { %2266 = vmatprep.subr.mxu1 %v872_v54  ;;  %v874_v55 = vadd.f32 %v2382_v51, %v2878_v28  ;;  %v972_v45 = vsel %vm448_vm1, %v2167_v56, 1.0  ;;  %p2401_p2 = scmp.lt.s32.totalorder %s2399_s20, %s2393_s15 }
 0x210   : > { %2267 = vmatpush3.msra.mxu1 %v872_v54 }
 0x211   : > { %2268 = vmatprep.subr.mxu1 %v871_v23  ;;  %2383 = vrcp.f32 %v874_v55  ;;  %p2402_p3 = por %p2401_p2, %p2400_p1 }
 0x212   : > { %2269 = vmatpush3.msra.mxu1 %v871_v23 }
 0x213   : > { %2270 = vmatprep.subr.mxu1 %v870_v24  ;;  %p2403_p5 = pnand %p2402_p3, %p2396_p0 }
 0x214   : > { %2271 = vmatpush3.msra.mxu1 %v870_v24 }
 0x215   : > { %2272 = vmatprep.subr.mxu1 %v869_v25 }
 0x216   : > { %2273 = vmatpush3.msra.mxu1 %v869_v25 }
 0x217   : > { %2274 = vmatprep.subr.mxu1 %v868_v2 }
 0x218   : > { %2275 = vmatpush3.msra.mxu1 %v868_v2 }
 0x219   : > { %2276 = vmatprep.subr.mxu1 %v867_v43 }
 0x21a   : > { %2277 = vmatpush3.msra.mxu1 %v867_v43 }
 0x21b   : > { %2278 = vmatprep.subr.mxu1 %v866_v26 }
 0x21c   : > { %2279 = vmatpush3.msra.mxu1 %v866_v26 }
 0x21d   : > { %2281 = vmatmul.mubr.msk.f32.vlgmr.msra.gmra.mxu1 %vm3464_vm5, %v2907_v44  ;;  %2283 = vmatprep.subr.msk.mxu1 %vm526_vm2, %v972_v45 }
 0x21e   : > { %2285 = vmatprep.mubr.msk.f32.mxu1 %vm501_vm3, %v2600_v13  ;;  %2284 = vmatpush3.msk.msra.mxu1 %vm526_vm2, %v972_v45  ;;  %v964_v13 = vmul.f32 %v2167_v56, %v2167_v56  ;;  %v2384_v57 = vpop.eup %2383 }
 0x221   : > { %2286 = vmatmul.mubr.msk.f32.vlgmr.msra.gmra.mxu1 %vm501_vm3, %v2604_v14  ;;  %v965_v14 = vsel %vm448_vm1, %v964_v13, 0.0 }
 0x222   : > { %2288 = vmatprep.mubr.msk.f32.mxu1 %vm501_vm3, %v2608_v15  ;;  %v966_v15 = vrot.slane %v965_v14, 4 }
 0x225   : > { %2289 = vmatmul.mubr.msk.f32.gmra.mxu1 %vm501_vm3, %v2612_v16  ;;  %v967_v16 = vadd.f32 %v966_v15, %v965_v14 }
 0x226   : > { %2291 = vmatprep.mubr.msk.f32.mxu1 %vm501_vm3, %v2616_v17 }
 0x227   : > { %v968_v17 = vrot.slane %v967_v16, 2 }
 0x229   : > { %2292 = vmatmul.mubr.msk.f32.gmra.mxu1 %vm501_vm3, %v2620_v18 }
 0x22a   : > { %2294 = vmatprep.mubr.msk.f32.mxu1 %vm501_vm3, %v2624_v19  ;;  %v969_v19 = vadd.f32 %v968_v17, %v967_v16 }
 0x22c   : > { %v970_v59 = vrot.slane %v969_v19, 1 }
 0x22d   : > { %2295 = vmatmul.mubr.msk.f32.gmra.mxu1 %vm501_vm3, %v2628_v20 }
 0x22e   : > { %2313 = vmatprep.mubr.msk.f32.mxu1 %vm3464_vm5, %v2703_v27  ;;  %v971_v30 = vadd.f32 %v970_v59, %v969_v19 }
 0x2dd   : > { %v2282_v58 = vpop.f32.mrf.mxu1 }
 0x2de   : > { %v2933_v46 = vmul.f32 %v2384_v57, %v2282_v58 }
 0x2df   : > { %v948_v18 = vpop.f32.mrf.mxu1 }
 0x2e0   : > { %v2935_v47 = vmul.f32 %v2384_v57, %v948_v18 }
 0x2e1   : > { %v2287_v28 = vpop.f32.mrf.mxu1 }
 0x2e2   : > { %v1048_v48 = vadd.f32 %v2287_v28, %v971_v30 }
 0x2e3   : > { %v1042_v20 = vpop.f32.mrf.mxu1 }
 0x2e4   : > { %v1043_v32 = vadd.f32 %v1042_v20, %v971_v30  ;;  %v2945_v49 = vmax.f32 %v1048_v48, 0.0 }
 0x2e5   : > { %v2290_v29 = vpop.f32.mrf.mxu1 }
 0x2e6   : > { %v1058_v34 = vadd.f32 %v2290_v29, %v971_v30  ;;  %v2939_v39 = vmax.f32 %v1043_v32, 0.0 }
 0x2e7   : > { %v1052_v27 = vpop.f32.mrf.mxu1 }
 0x2e8   : > { %v1053_v35 = vadd.f32 %v1052_v27, %v971_v30  ;;  %v2947_v50 = vmax.f32 %v1058_v34, 0.0 }
 0x2e9   : > { %v2293_v31 = vpop.f32.mrf.mxu1 }
 0x2ea   : > { %v1068_v33 = vadd.f32 %v2293_v31, %v971_v30  ;;  %v1083_v42 = vmax.f32 %v1053_v35, 0.0 }
 0x2eb   : > { %v1062_v60 = vpop.f32.mrf.mxu1 }
 0x2ec   : > { %v1063_v61 = vadd.f32 %v1062_v60, %v971_v30  ;;  %v2941_v40 = vmax.f32 %v1068_v33, 0.0 }
 0x2ed   : > { %v2296_v62 = vpop.f32.mrf.mxu1 }
 0x2ee   : > { %v2937_v36 = vmax.f32 %v1063_v61, 0.0  ;;  %v1078_v37 = vadd.f32 %v2296_v62, %v971_v30  ;;  %v1090_v6 = vmin.f32 %v2945_v49, %v2941_v40 }
 0x2ef   : > { %v1072_v38 = vpop.f32.mrf.mxu1 }
 0x2f0   : > { %v2943_v41 = vmax.f32 %v1078_v37, 0.0  ;;  %v1073_v52 = vadd.f32 %v1072_v38, %v971_v30  ;;  %v1089_v63 = vmin.f32 %v2939_v39, %v2937_v36 }
 0x2f2   : > { %v1087_v1 = vmax.f32 %v1073_v52, 0.0  ;;  %v1092_v11 = vmin.f32 %v2947_v50, %v2943_v41  ;;  %v1093_v21 = vmin.f32 %v1089_v63, %v1090_v6 }
 0x2f4   : > { %v1091_v12 = vmin.f32 %v1083_v42, %v1087_v1 }
 0x2f6   : > { %v1094_v53 = vmin.f32 %v1091_v12, %v1092_v11 }
 0x2f8   : > { %v1095_v51 = vmin.f32 %v1093_v21, %v1094_v53 }
 0x2fa   : > { %v1096_v22 = vrot.slane %v1095_v51, 4 }
 0x2fc   : > { %v1097_v54 = vmin.f32 %v1095_v51, %v1096_v22 }
 0x2fe   : > { %v1098_v23 = vrot.slane %v1097_v54, 2 }
 0x300   : > { %v1099_v24 = vmin.f32 %v1097_v54, %v1098_v23 }
 0x302   : > { %v1100_v25 = vrot.slane %v1099_v24, 1 }
 0x304   : > { %v1101_v2 = vmin.f32 %v1099_v24, %v1100_v25 }
 0x306   : > { %vm1102_vm1 = vcmp.eq.f32.partialorder %v2939_v39, %v1101_v2  ;;  %vm1103_vm2 = vcmp.eq.f32.partialorder %v2945_v49, %v1101_v2  ;;  %vm1104_vm3 = vcmp.eq.f32.partialorder %v1083_v42, %v1101_v2  ;;  %vm1105_vm10 = vcmp.eq.f32.partialorder %v2947_v50, %v1101_v2 }
 0x307   : > { %vm1106_vm11 = vcmp.eq.f32.partialorder %v2937_v36, %v1101_v2  ;;  %vm1107_vm13 = vcmp.eq.f32.partialorder %v2941_v40, %v1101_v2  ;;  %vm1108_vm14 = vcmp.eq.f32.partialorder %v1087_v1, %v1101_v2  ;;  %vm1109_vm15 = vcmp.eq.f32.partialorder %v2943_v41, %v1101_v2 }
 0x308   : > { %v1110_v43 = vsel %vm1102_vm1, %v2657_v0, 64  ;;  %v1111_v26 = vsel %vm1103_vm2, %v2660_v3, 64  ;;  %v1112_v55 = vsel %vm1104_vm3, %v2663_v4, 64  ;;  %v1113_v56 = vsel %vm1105_vm10, %v2666_v5, 64 }
 0x309   : > { %v1114_v45 = vsel %vm1106_vm11, %v2669_v7, 64  ;;  %v1115_v13 = vsel %vm1107_vm13, %v2672_v8, 64  ;;  %v1116_v14 = vsel %vm1108_vm14, %v2675_v9, 64  ;;  %v1117_v15 = vsel %vm1109_vm15, %v2678_v10, 64 }
 0x30a   : > { %vm1118_vm0 = vcmp.lt.s32.totalorder %v1110_v43, %v1114_v45  ;;  %vm1120_vm12 = vcmp.lt.s32.totalorder %v1111_v26, %v1115_v13  ;;  %vm1122_vm4 = vcmp.lt.s32.totalorder %v1112_v55, %v1116_v14  ;;  %vm1124_vm6 = vcmp.lt.s32.totalorder %v1113_v56, %v1117_v15 }
 0x30b   : > { %v1119_v16 = vsel %vm1118_vm0, %v1110_v43, %v1114_v45  ;;  %v1121_v57 = vsel %vm1120_vm12, %v1111_v26, %v1115_v13  ;;  %v1123_v17 = vsel %vm1122_vm4, %v1112_v55, %v1116_v14  ;;  %v1125_v58 = vsel %vm1124_vm6, %v1113_v56, %v1117_v15 }
 0x30c   : > { %vm1126_vm7 = vcmp.lt.s32.totalorder %v1119_v16, %v1121_v57  ;;  %vm1128_vm8 = vcmp.lt.s32.totalorder %v1123_v17, %v1125_v58  ;;  %v1149_v28 = vadd.f32 1e-08, %v1101_v2 }
 0x30d   : > { %v1127_v18 = vsel %vm1126_vm7, %v1119_v16, %v1121_v57  ;;  %v1129_v19 = vsel %vm1128_vm8, %v1123_v17, %v1125_v58 }
 0x30e   : > { %vm1130_vm9 = vcmp.lt.s32.totalorder %v1127_v18, %v1129_v19  ;;  %2385 = vrcp.f32 %v1149_v28 }
 0x30f   : > { %v1131_v20 = vsel %vm1130_vm9, %v1127_v18, %v1129_v19 }
 0x310   : > { %v1132_v59 = vrot.slane %v1131_v20, 4 }
 0x312   : > { %vm1133_vm1 = vcmp.lt.s32.totalorder %v1131_v20, %v1132_v59 }
 0x313   : > { %v1134_v29 = vsel %vm1133_vm1, %v1131_v20, %v1132_v59 }
 0x314   : > { %v1135_v27 = vrot.slane %v1134_v29, 2 }
 0x316   : > { %vm1136_vm2 = vcmp.lt.s32.totalorder %v1134_v29, %v1135_v27 }
 0x317   : > { %v1137_v30 = vsel %vm1136_vm2, %v1134_v29, %v1135_v27 }
 0x318   : > { %v1138_v31 = vrot.slane %v1137_v30, 1 }
 0x31a   : > { %vm1139_vm3 = vcmp.lt.s32.totalorder %v1137_v30, %v1138_v31 }
 0x31b   : > { %v1140_v60 = vsel %vm1139_vm3, %v1137_v30, %v1138_v31  ;;  %v2983_v61 = vpop.eup %2385 }
 0x31c   : > { %vm1143_vm10 = vcmp.eq.s32.totalorder %v2663_v4, %v1140_v60  ;;  %vm1147_vm11 = vcmp.eq.s32.totalorder %v2675_v9, %v1140_v60  ;;  %vm1141_vm13 = vcmp.eq.s32.totalorder %v2657_v0, %v1140_v60  ;;  %vm1142_vm14 = vcmp.eq.s32.totalorder %v2660_v3, %v1140_v60 }
 0x31d   : > { %v2975_v32 = vsel %vm1143_vm10, inf, %v1083_v42  ;;  %v2979_v33 = vsel %vm1147_vm11, inf, %v1087_v1  ;;  %vm1144_vm15 = vcmp.eq.s32.totalorder %v2666_v5, %v1140_v60  ;;  %vm1145_vm0 = vcmp.eq.s32.totalorder %v2669_v7, %v1140_v60 }
 0x31e   : > { %v1171_v48 = vmin.f32 %v2975_v32, %v2979_v33  ;;  %vm1146_vm12 = vcmp.eq.s32.totalorder %v2672_v8, %v1140_v60  ;;  %vm1148_vm4 = vcmp.eq.s32.totalorder %v2678_v10, %v1140_v60  ;;  %v2992_v62 = vsel %vm1141_vm13, inf, %v2939_v39 }
 0x31f   : > { %v2995_v34 = vsel %vm1148_vm4, %v2983_v61, 0.0  ;;  %v3000_v35 = vsel %vm1142_vm14, inf, %v2945_v49  ;;  %v3005_v37 = vsel %vm1144_vm15, inf, %v2947_v50  ;;  %v3010_v38 = vsel %vm1145_vm0, inf, %v2937_v36 }
 0x320   : > { %v3013_v39 = vsel %vm1146_vm12, inf, %v2941_v40  ;;  %v3016_v52 = vsel %vm1148_vm4, inf, %v2943_v41  ;;  %v1169_v49 = vmin.f32 %v2992_v62, %v3010_v38  ;;  %v3023_v42 = vsel %vm1147_vm11, %v2983_v61, 0.0 }
 0x321   : > { %v1170_v50 = vmin.f32 %v3000_v35, %v3013_v39  ;;  %v1172_v36 = vmin.f32 %v3005_v37, %v3016_v52  ;;  %v3030_v40 = vsel %vm1146_vm12, %v2983_v61, 0.0  ;;  %v3035_v41 = vsel %vm1145_vm0, %v2983_v61, 0.0 }
 0x322   : > { %v3040_v63 = vsel %vm1144_vm15, %v2983_v61, 0.0  ;;  %v3045_v1 = vsel %vm1143_vm10, %v2983_v61, 0.0  ;;  %v3050_v6 = vsel %vm1142_vm14, %v2983_v61, 0.0  ;;  %v3055_v11 = vsel %vm1141_vm13, %v2983_v61, 0.0 }
 0x323   : > { %v1173_v12 = vmin.f32 %v1169_v49, %v1170_v50  ;;  %v1174_v21 = vmin.f32 %v1171_v48, %v1172_v36 }
 0x325   : > { %v1175_v53 = vmin.f32 %v1173_v12, %v1174_v21 }
 0x327   : > { %v1176_v51 = vrot.slane %v1175_v53, 4 }
 0x329   : > { %v1177_v22 = vmin.f32 %v1175_v53, %v1176_v51 }
 0x32b   : > { %v1178_v54 = vrot.slane %v1177_v22, 2 }
 0x32d   : > { %v1179_v23 = vmin.f32 %v1177_v22, %v1178_v54 }
 0x32f   : > { %v1180_v24 = vrot.slane %v1179_v23, 1 }
 0x331   : > { %v1181_v25 = vmin.f32 %v1179_v23, %v1180_v24 }
 0x333   : > { %vm1182_vm6 = vcmp.eq.f32.partialorder %v2992_v62, %v1181_v25  ;;  %vm1183_vm7 = vcmp.eq.f32.partialorder %v3000_v35, %v1181_v25  ;;  %vm1184_vm8 = vcmp.eq.f32.partialorder %v2975_v32, %v1181_v25  ;;  %vm1185_vm9 = vcmp.eq.f32.partialorder %v3005_v37, %v1181_v25 }
 0x334   : > { %vm1186_vm1 = vcmp.eq.f32.partialorder %v3010_v38, %v1181_v25  ;;  %vm1187_vm2 = vcmp.eq.f32.partialorder %v3013_v39, %v1181_v25  ;;  %vm1188_vm3 = vcmp.eq.f32.partialorder %v2979_v33, %v1181_v25  ;;  %vm1189_vm10 = vcmp.eq.f32.partialorder %v3016_v52, %v1181_v25 }
 0x335   : > { %v1190_v2 = vsel %vm1182_vm6, %v2657_v0, 64  ;;  %v1191_v43 = vsel %vm1183_vm7, %v2660_v3, 64  ;;  %v1192_v26 = vsel %vm1184_vm8, %v2663_v4, 64  ;;  %v1193_v55 = vsel %vm1185_vm9, %v2666_v5, 64 }
 0x336   : > { %v1194_v56 = vsel %vm1186_vm1, %v2669_v7, 64  ;;  %v1195_v45 = vsel %vm1187_vm2, %v2672_v8, 64  ;;  %v1196_v13 = vsel %vm1188_vm3, %v2675_v9, 64  ;;  %v1197_v14 = vsel %vm1189_vm10, %v2678_v10, 64 }
 0x337   : > { %vm1198_vm11 = vcmp.lt.s32.totalorder %v1190_v2, %v1194_v56  ;;  %vm1200_vm13 = vcmp.lt.s32.totalorder %v1191_v43, %v1195_v45  ;;  %vm1202_vm14 = vcmp.lt.s32.totalorder %v1192_v26, %v1196_v13  ;;  %vm1204_vm15 = vcmp.lt.s32.totalorder %v1193_v55, %v1197_v14 }
 0x338   : > { %v1199_v15 = vsel %vm1198_vm11, %v1190_v2, %v1194_v56  ;;  %v1201_v16 = vsel %vm1200_vm13, %v1191_v43, %v1195_v45  ;;  %v1203_v57 = vsel %vm1202_vm14, %v1192_v26, %v1196_v13  ;;  %v1205_v17 = vsel %vm1204_vm15, %v1193_v55, %v1197_v14 }
 0x339   : > { %vm1206_vm0 = vcmp.lt.s32.totalorder %v1199_v15, %v1201_v16  ;;  %vm1208_vm12 = vcmp.lt.s32.totalorder %v1203_v57, %v1205_v17  ;;  %v1229_v28 = vadd.f32 1e-08, %v1181_v25 }
 0x33a   : > { %v1207_v58 = vsel %vm1206_vm0, %v1199_v15, %v1201_v16  ;;  %v1209_v18 = vsel %vm1208_vm12, %v1203_v57, %v1205_v17 }
 0x33b   : > { %vm1210_vm4 = vcmp.lt.s32.totalorder %v1207_v58, %v1209_v18  ;;  %2387 = vrcp.f32 %v1229_v28 }
 0x33c   : > { %v1211_v19 = vsel %vm1210_vm4, %v1207_v58, %v1209_v18 }
 0x33d   : > { %v1212_v20 = vrot.slane %v1211_v19, 4 }
 0x33f   : > { %vm1213_vm6 = vcmp.lt.s32.totalorder %v1211_v19, %v1212_v20 }
 0x340   : > { %v1214_v59 = vsel %vm1213_vm6, %v1211_v19, %v1212_v20 }
 0x341   : > { %v1215_v29 = vrot.slane %v1214_v59, 2 }
 0x343   : > { %vm1216_vm7 = vcmp.lt.s32.totalorder %v1214_v59, %v1215_v29 }
 0x344   : > { %v1217_v27 = vsel %vm1216_vm7, %v1214_v59, %v1215_v29 }
 0x345   : > { %v1218_v30 = vrot.slane %v1217_v27, 1 }
 0x347   : > { %vm1219_vm8 = vcmp.lt.s32.totalorder %v1217_v27, %v1218_v30 }
 0x348   : > { %v3073_v31 = vsel %vm1219_vm8, %v1217_v27, %v1218_v30  ;;  %v3119_v36 = vpop.eup %2387 }
 0x349   : > { %vm3465_vm9 = vcmp.eq.s32.totalorder %v2657_v0, %v3073_v31  ;;  %vm3466_vm1 = vcmp.eq.s32.totalorder %v2660_v3, %v3073_v31  ;;  %vm3467_vm2 = vcmp.eq.s32.totalorder %v2663_v4, %v3073_v31  ;;  %vm3468_vm3 = vcmp.eq.s32.totalorder %v2666_v5, %v3073_v31 }
 0x34a   : > { %vm1225_vm10 = vcmp.eq.s32.totalorder %v2669_v7, %v3073_v31  ;;  %vm1226_vm11 = vcmp.eq.s32.totalorder %v2672_v8, %v3073_v31  ;;  %vm1227_vm13 = vcmp.eq.s32.totalorder %v2675_v9, %v3073_v31  ;;  %vm1228_vm14 = vcmp.eq.s32.totalorder %v2678_v10, %v3073_v31 }
 0x34b   : > { %v1241_v60 = vsel %vm3465_vm9, inf, %v2992_v62  ;;  %v1242_v48 = vsel %vm3466_vm1, inf, %v3000_v35  ;;  %v1243_v49 = vsel %vm3467_vm2, inf, %v2975_v32  ;;  %v1244_v50 = vsel %vm3468_vm3, inf, %v3005_v37 }
 0x34c   : > { %v1245_v62 = vsel %vm1225_vm10, inf, %v3010_v38  ;;  %v1246_v35 = vsel %vm1226_vm11, inf, %v3013_v39  ;;  %v1247_v32 = vsel %vm1227_vm13, inf, %v2979_v33  ;;  %v1248_v37 = vsel %vm1228_vm14, inf, %v3016_v52 }
 0x34d   : > { %v1249_v12 = vmin.f32 %v1241_v60, %v1245_v62  ;;  %v1250_v21 = vmin.f32 %v1242_v48, %v1246_v35  ;;  %v1251_v38 = vmin.f32 %v1243_v49, %v1247_v32  ;;  %v1252_v53 = vmin.f32 %v1244_v50, %v1248_v37 }
 0x34e   : > { %v1240_v39 = vadd.f32 %v3119_v36, %v2983_v61 }
 0x34f   : > { %v1253_v51 = vmin.f32 %v1249_v12, %v1250_v21  ;;  %v1254_v22 = vmin.f32 %v1251_v38, %v1252_v53  ;;  %v1402_v12 = vld [vmem:[%s427_s29] sm:$0xff]  ;;  %v1415_v38 = vld [vmem:[%s3458_s4 + $0x28] sm:$0xff]  ;;  %v1416_v53 = vld [vmem:[%s3458_s4 + $0x30] sm:$0xff] }
 0x350   : > { %v1414_v21 = vld [vmem:[%s3458_s4 + $0x20] sm:$0xff] }
 0x351   : > { %v1255_v54 = vmin.f32 %v1253_v51, %v1254_v22  ;;  %v1417_v51 = vld [vmem:[%s3458_s4 + $0x38] sm:$0xff]  ;;  %v1707_v22 = vld [vmem:[%s3460_s6 + $0x30] sm:$0xff] }
 0x353   : > { %v1256_v23 = vrot.slane %v1255_v54, 4 }
 0x355   : > { %v1257_v24 = vmin.f32 %v1255_v54, %v1256_v23  ;;  %v1706_v54 = vld [vmem:[%s3460_s6 + $0x28] sm:$0xff]  ;;  %v1708_v23 = vld [vmem:[%s3460_s6 + $0x38] sm:$0xff] }
 0x357   : > { %v1258_v33 = vrot.slane %v1257_v24, 2 }
 0x359   : > { %v1259_v25 = vmin.f32 %v1257_v24, %v1258_v33  ;;  %v1705_v24 = vld [vmem:[%s3460_s6 + $0x20] sm:$0xff]  ;;  %v1704_v33 = vld [vmem:[%s3460_s6 + $0x18] sm:$0xff] }
 0x35b   : > { %v1260_v2 = vrot.slane %v1259_v25, 1 }
 0x35d   : > { %v1261_v43 = vmin.f32 %v1259_v25, %v1260_v2  ;;  %v1703_v25 = vld [vmem:[%s3460_s6 + $0x10] sm:$0xff]  ;;  %v1702_v2 = vld [vmem:[%s3460_s6 + $0x8] sm:$0xff] }
 0x35f   : > { %vm1262_vm15 = vcmp.eq.f32.partialorder %v1241_v60, %v1261_v43  ;;  %vm1263_vm0 = vcmp.eq.f32.partialorder %v1242_v48, %v1261_v43  ;;  %vm1264_vm12 = vcmp.eq.f32.partialorder %v1243_v49, %v1261_v43  ;;  %vm1265_vm4 = vcmp.eq.f32.partialorder %v1244_v50, %v1261_v43 }
 0x360   : > { %vm1266_vm6 = vcmp.eq.f32.partialorder %v1245_v62, %v1261_v43  ;;  %vm1267_vm7 = vcmp.eq.f32.partialorder %v1246_v35, %v1261_v43  ;;  %vm1268_vm8 = vcmp.eq.f32.partialorder %v1247_v32, %v1261_v43  ;;  %vm1269_vm5 = vcmp.eq.f32.partialorder %v1248_v37, %v1261_v43  ;;  %v1403_v37 = vld [vmem:[%s427_s29 + $0x8] sm:$0xff] }
 0x361   : > { %v1270_v52 = vsel %vm1262_vm15, %v2657_v0, 64  ;;  %v1271_v26 = vsel %vm1263_vm0, %v2660_v3, 64  ;;  %v1272_v61 = vsel %vm1264_vm12, %v2663_v4, 64  ;;  %v1273_v55 = vsel %vm1265_vm4, %v2666_v5, 64 }
 0x362   : > { %v1274_v56 = vsel %vm1266_vm6, %v2669_v7, 64  ;;  %v1275_v45 = vsel %vm1267_vm7, %v2672_v8, 64  ;;  %v1276_v13 = vsel %vm1268_vm8, %v2675_v9, 64  ;;  %v1277_v14 = vsel %vm1269_vm5, %v2678_v10, 64 }
 0x363   : > { %vm1278_vm9 = vcmp.lt.s32.totalorder %v1270_v52, %v1274_v56  ;;  %vm1280_vm1 = vcmp.lt.s32.totalorder %v1271_v26, %v1275_v45  ;;  %vm1282_vm2 = vcmp.lt.s32.totalorder %v1272_v61, %v1276_v13  ;;  %vm1284_vm3 = vcmp.lt.s32.totalorder %v1273_v55, %v1277_v14 }
 0x364   : > { %v1279_v15 = vsel %vm1278_vm9, %v1270_v52, %v1274_v56  ;;  %v1281_v16 = vsel %vm1280_vm1, %v1271_v26, %v1275_v45  ;;  %v1283_v57 = vsel %vm1282_vm2, %v1272_v61, %v1276_v13  ;;  %v1285_v17 = vsel %vm1284_vm3, %v1273_v55, %v1277_v14  ;;  %v1789_v52 = vld [vmem:[%s3462_s8] sm:$0xff]  ;;  %v1790_v26 = vld [vmem:[%s3462_s8 + $0x8] sm:$0xff]  ;;  %v1791_v61 = vld [vmem:[%s3462_s8 + $0x10] sm:$0xff] }
 0x365   : > { %vm1286_vm15 = vcmp.lt.s32.totalorder %v1279_v15, %v1281_v16  ;;  %vm1288_vm0 = vcmp.lt.s32.totalorder %v1283_v57, %v1285_v17  ;;  %v1309_v58 = vadd.f32 1e-08, %v1261_v43  ;;  %v1239_v49 = vsel %vm1228_vm14, %v3119_v36, %v2995_v34  ;;  %v1701_v43 = vld [vmem:[%s3460_s6] sm:$0xff]  ;;  %v1792_v55 = vld [vmem:[%s3462_s8 + $0x18] sm:$0xff]  ;;  %v1794_v45 = vld [vmem:[%s3462_s8 + $0x28] sm:$0xff] }
 0x366   : > { %v1287_v18 = vsel %vm1286_vm15, %v1279_v15, %v1281_v16  ;;  %v1289_v19 = vsel %vm1288_vm0, %v1283_v57, %v1285_v17  ;;  %v1238_v62 = vsel %vm1227_vm13, %v3119_v36, %v3023_v42  ;;  %vm3473_vm8 = vcmp.eq.s32.totalorder %v2660_v3, %v3073_v31  ;;  %v1793_v56 = vld [vmem:[%s3462_s8 + $0x20] sm:$0xff]  ;;  %v1795_v13 = vld [vmem:[%s3462_s8 + $0x30] sm:$0xff]  ;;  %v1796_v14 = vld [vmem:[%s3462_s8 + $0x38] sm:$0xff] }
 0x367   : > { %vm1290_vm12 = vcmp.lt.s32.totalorder %v1287_v18, %v1289_v19  ;;  %2389 = vrcp.f32 %v1309_v58  ;;  %vm3474_vm0 = vcmp.eq.s32.totalorder %v2657_v0, %v3073_v31 }
 0x368   : > { %v1291_v28 = vsel %vm1290_vm12, %v1287_v18, %v1289_v19  ;;  %vm3475_vm12 = vcmask 523264   ;;  %v1418_v18 = vld [vmem:[%s3459_s5] sm:$0xff]  ;;  %v1419_v19 = vld [vmem:[%s3459_s5 + $0x8] sm:$0xff] }
 0x369   : > { %v1292_v20 = vrot.slane %v1291_v28, 4 }
 0x36b   : > { %vm1293_vm4 = vcmp.lt.s32.totalorder %v1291_v28, %v1292_v20 }
 0x36c   : > { %v1294_v59 = vsel %vm1293_vm4, %v1291_v28, %v1292_v20  ;;  %vm1426_vm4 = vcmask 130048   ;;  %v1422_v28 = vld [vmem:[%s3459_s5 + $0x20] sm:$0xff]  ;;  %v1423_v20 = vld [vmem:[%s3459_s5 + $0x28] sm:$0xff] }
 0x36d   : > { %v1295_v29 = vrot.slane %v1294_v59, 2 }
 0x36f   : > { %vm1296_vm5 = vcmp.lt.s32.totalorder %v1294_v59, %v1295_v29 }
 0x370   : > { %v1297_v27 = vsel %vm1296_vm5, %v1294_v59, %v1295_v29  ;;  %v1424_v59 = vld [vmem:[%s3459_s5 + $0x30] sm:$0xff]  ;;  %v1425_v29 = vld [vmem:[%s3459_s5 + $0x38] sm:$0xff]  ;;  %vm3476_vm5 = vmmov %vm3475_vm12 }
 0x371   : > { %v1298_v30 = vrot.slane %v1297_v27, 1 }
 0x373   : > { %vm1299_vm6 = vcmp.lt.s32.totalorder %v1297_v27, %v1298_v30 }
 0x374   : > { %v1300_v60 = vsel %vm1299_vm6, %v1297_v27, %v1298_v30  ;;  %v2390_v48 = vpop.eup %2389  ;;  %vm3477_vm6 = vmmov %vm3476_vm5 }
 0x375   : > { %vm1308_vm9 = vcmp.eq.s32.totalorder %v2678_v10, %v1300_v60  ;;  %vm1307_vm1 = vcmp.eq.s32.totalorder %v2675_v9, %v1300_v60  ;;  %vm1306_vm2 = vcmp.eq.s32.totalorder %v2672_v8, %v1300_v60  ;;  %v1237_v10 = vsel %vm1226_vm11, %v3119_v36, %v3030_v40 }
 0x376   : > { %v1319_v50 = vsel %vm1308_vm9, %v2390_v48, %v1239_v49  ;;  %v1318_v35 = vsel %vm1307_vm1, %v2390_v48, %v1238_v62  ;;  %vm1305_vm3 = vcmp.eq.s32.totalorder %v2669_v7, %v1300_v60  ;;  %v3154_v34 = vadd.f32 %v2390_v48, %v1240_v39  ;;  %vm3478_vm9 = vmmov %vm3476_vm5 }
 0x377   : > { %2297 = vmatprep.subr.mxu1 %v1319_v50  ;;  %v1317_v32 = vsel %vm1306_vm2, %v2390_v48, %v1237_v10  ;;  %v1236_v9 = vsel %vm1225_vm10, %v3119_v36, %v3035_v41  ;;  %vm1304_vm13 = vcmp.eq.s32.totalorder %v2666_v5, %v1300_v60  ;;  %vm3471_vm11 = vcmp.eq.s32.totalorder %v2666_v5, %v3073_v31  ;;  %vm3479_vm1 = vmmov %vm3476_vm5 }
 0x378   : > { %2298 = vmatpush3.msra.mxu1 %v1319_v50  ;;  %v1316_v42 = vsel %vm1305_vm3, %v2390_v48, %v1236_v9  ;;  %v1235_v8 = vsel %vm3471_vm11, %v3119_v36, %v3040_v63  ;;  %vm1303_vm14 = vcmp.eq.s32.totalorder %v2663_v4, %v1300_v60  ;;  %vm3472_vm10 = vcmp.eq.s32.totalorder %v2663_v4, %v3073_v31  ;;  %v1412_v31 = vld [vmem:[%s3458_s4 + $0x10] sm:$0xff]  ;;  %vm3480_vm2 = vmmov %vm3479_vm1 }
 0x379   : > { %2299 = vmatprep.subr.mxu1 %v1318_v35  ;;  %v1315_v40 = vsel %vm1304_vm13, %v2390_v48, %v1235_v8  ;;  %v1234_v7 = vsel %vm3472_vm10, %v3119_v36, %v3045_v1  ;;  %vm1302_vm7 = vcmp.eq.s32.totalorder %v2660_v3, %v1300_v60  ;;  %v1233_v5 = vsel %vm3473_vm8, %v3119_v36, %v3050_v6  ;;  %v1405_v3 = vld [vmem:[%s427_s29 + $0x18] sm:$0xff]  ;;  %v1404_v6 = vld [vmem:[%s427_s29 + $0x10] sm:$0xff]  ;;  %vm3481_vm3 = vmmov %vm3479_vm1  ;;  %s3401_s29 = scalar_lea.hbm %s3463_s9, %s2211_s25 }
 0x37a   : > { %2300 = vmatpush3.msra.mxu1 %v1318_v35  ;;  %v1314_v41 = vsel %vm1303_vm14, %v2390_v48, %v1234_v7  ;;  %vm1301_vm15 = vcmp.eq.s32.totalorder %v2657_v0, %v1300_v60  ;;  %v1313_v63 = vsel %vm1302_vm7, %v2390_v48, %v1233_v5  ;;  %v1232_v4 = vsel %vm3474_vm0, %v3119_v36, %v3055_v11  ;;  %v1410_v11 = vld [vmem:[%s3458_s4] sm:$0xff]  ;;  %v1413_v36 = vld [vmem:[%s3458_s4 + $0x18] sm:$0xff]  ;;  %vm3482_vm13 = vmmov %vm3479_vm1 }
 0x37b   : > { %2301 = vmatprep.subr.mxu1 %v1317_v32  ;;  %v1312_v1 = vsel %vm1301_vm15, %v2390_v48, %v1232_v4  ;;  %v2471_v0 = vmov 0.0   ;;  %v2472_v39 = vmov 0   ;;  %2391 = vrcp.f32 %v3154_v34  ;;  %vm3483_vm11 = vmmov %vm3479_vm1 }
 0x37c   : > { %2302 = vmatpush3.msra.mxu1 %v1317_v32  ;;  %1515 = vmatprep.mubr.f32.mxu0 %v2471_v0 }
 0x37d   : > { %2303 = vmatprep.subr.mxu1 %v1316_v42  ;;  %2376 = vset.pattern.permute.xlu1 %v2472_v39 }
 0x37e   : > { %2304 = vmatpush3.msra.mxu1 %v1316_v42  ;;  %2375 = vset.pattern.permute.xlu0 %v2472_v39 }
 0x37f   : > { %2305 = vmatprep.subr.mxu1 %v1315_v40  ;;  %1741 = vperm.xlu1 %2376, %v1707_v22  }
 0x380   : > { %2306 = vmatpush3.msra.mxu1 %v1315_v40  ;;  %1746 = vperm.xlu0 %2375, %v1708_v23  }
 0x381   : > { %2307 = vmatprep.subr.mxu1 %v1314_v41 }
 0x382   : > { %2308 = vmatpush3.msra.mxu1 %v1314_v41 }
 0x383   : > { %2309 = vmatprep.subr.mxu1 %v1313_v63  ;;  %1736 = vperm.xlu1 %2376, %v1706_v54  }
 0x384   : > { %2310 = vmatpush3.msra.mxu1 %v1313_v63 }
 0x385   : > { %2311 = vmatprep.subr.mxu1 %v1312_v1 }
 0x386   : > { %2312 = vmatpush3.msra.mxu1 %v1312_v1 }
 0x387   : > { %2314 = vmatmul.mubr.msk.f32.vlgmr.msra.gmra.mxu1 %vm3475_vm12, %v2907_v44  ;;  %1616 = vmatprep.subr.mxu1 %v1405_v3  ;;  %v1411_v44 = vld [vmem:[%s3458_s4 + $0x8] sm:$0xff] }
 0x388   : > { %1617 = vmatpush1.msra.mxu1 %v1404_v6  ;;  %1652 = vmatprep.mubr.f32.mxu1 %v2471_v0  ;;  %v2392_v15 = vpop.eup %2391 }
 0x389   : > { %1618 = vmatprep.subr.mxu1 %v1403_v37  ;;  %1731 = vperm.xlu1 %2376, %v1705_v24  }
 0x38a   : > { %1619 = vmatpush1.msra.mxu1 %v1402_v12 }
 0x38b   : > { %2187 = vmatmul.mubr.msk.f32.vlgmr.msra.gmra.mxu1 %vm1426_vm4, %v1410_v11 }
 0x38c   : > { %1658 = vmatprep.mubr.f32.mxu1 %v2471_v0 }
 0x38d   : > { %1726 = vperm.xlu1 %2376, %v1704_v33  }
 0x38f   : > { %2188 = vmatmul.mubr.msk.f32.gmra.mxu1 %vm1426_vm4, %v1411_v44 }
 0x390   : > { %1664 = vmatprep.mubr.f32.mxu1 %v2471_v0 }
 0x391   : > { %1721 = vperm.xlu1 %2376, %v1703_v25  }
 0x393   : > { %2189 = vmatmul.mubr.msk.f32.gmra.mxu1 %vm1426_vm4, %v1412_v31 }
 0x394   : > { %1670 = vmatprep.mubr.f32.mxu1 %v2471_v0 }
 0x395   : > { %1716 = vperm.xlu1 %2376, %v1702_v2  }
 0x397   : > { %2190 = vmatmul.mubr.msk.f32.gmra.mxu1 %vm1426_vm4, %v1413_v36 }
 0x398   : > { %1676 = vmatprep.mubr.f32.mxu1 %v2471_v0 }
 0x399   : > { %1711 = vperm.xlu1 %2376, %v1701_v43  }
 0x39b   : > { %2191 = vmatmul.mubr.msk.f32.gmra.mxu1 %vm1426_vm4, %v1414_v21 }
 0x39c   : > { %1682 = vmatprep.mubr.f32.mxu1 %v2471_v0 }
 0x39d   : > { %1799 = vperm.xlu1 %2376, %v1789_v52  }
 0x39f   : > { %2192 = vmatmul.mubr.msk.f32.gmra.mxu1 %vm1426_vm4, %v1415_v38 }
 0x3a0   : > { %1688 = vmatprep.mubr.f32.mxu1 %v2471_v0 }
 0x3a1   : > { %1804 = vperm.xlu1 %2376, %v1790_v26  }
 0x3a3   : > { %2193 = vmatmul.mubr.msk.f32.gmra.mxu1 %vm1426_vm4, %v1416_v53 }
 0x3a4   : > { %1694 = vmatprep.mubr.f32.mxu1 %v2471_v0 }
 0x3a5   : > { %1809 = vperm.xlu1 %2376, %v1791_v61  }
 0x3a7   : > { %2194 = vmatmul.mubr.msk.f32.gmra.mxu1 %vm1426_vm4, %v1417_v51 }
 0x3a9   : > { %1814 = vperm.xlu1 %2376, %v1792_v55  }
 0x3ad   : > { %1819 = vperm.xlu1 %2376, %v1793_v56  }
 0x3b1   : > { %1824 = vperm.xlu1 %2376, %v1794_v45  }
 0x3b5   : > { %1829 = vperm.xlu1 %2376, %v1795_v13  }
 0x3b9   : > { %1834 = vperm.xlu1 %2376, %v1796_v14  }
 0x3fa   : > { %v1742_v40 = vpop.permute.xlu1 %1741 }
 0x3fb   : > { %v1747_v23 = vpop.permute.xlu0 %1746 }
 0x3fe   : > { %v1737_v4 = vpop.permute.xlu1 %1736 }
 0x404   : > { %v1732_v11 = vpop.permute.xlu1 %1731 }
 0x408   : > { %v1727_v38 = vpop.permute.xlu1 %1726 }
 0x40c   : > { %v1722_v52 = vpop.permute.xlu1 %1721 }
 0x447   : > { %v2315_v16 = vpop.f32.mrf.mxu1 }
 0x448   : > { %v1398_v57 = vmul.f32 %v2392_v15, %v2315_v16 }
 0x449   : > { %v1387_v17 = vpop.f32.mrf.mxu1 }
 0x44a   : > { %v1397_v58 = vmul.f32 %v2392_v15, %v1387_v17  ;;  %1479 = vmatprep.subr.mxu0 %v1398_v57 }
 0x44b   : > { %1480 = vmatpush1.msra.mxu0 %v2933_v46  ;;  %v1420_v46 = vld [vmem:[%s3459_s5 + $0x10] sm:$0xff]  ;;  %v3323_v27 = vpop.f32.mrf.mxu1 }
 0x44c   : > { %1481 = vmatprep.subr.mxu0 %v1397_v58 }
 0x44d   : > { %1482 = vmatpush1.msra.mxu0 %v2935_v47  ;;  %v1421_v47 = vld [vmem:[%s3459_s5 + $0x18] sm:$0xff]  ;;  %v3325_v30 = vpop.f32.mrf.mxu1 }
 0x44e   : > { %2179 = vmatmul.mubr.msk.f32.vlgmr.msra.gmra.mxu0 %vm1426_vm4, %v1418_v18 }
 0x44f   : > { %1521 = vmatprep.mubr.f32.mxu0 %v2471_v0  ;;  %v3327_v60 = vpop.f32.mrf.mxu1 }
 0x451   : > { %v1662_v48 = vpop.f32.mrf.mxu1 }
 0x452   : > { %2180 = vmatmul.mubr.msk.f32.gmra.mxu0 %vm1426_vm4, %v1419_v19 }
 0x453   : > { %1527 = vmatprep.mubr.f32.mxu0 %v2471_v0  ;;  %v1666_v49 = vpop.f32.mrf.mxu1 }
 0x455   : > { %v1668_v50 = vpop.f32.mrf.mxu1 }
 0x456   : > { %2181 = vmatmul.mubr.msk.f32.gmra.mxu0 %vm1426_vm4, %v1420_v46 }
 0x457   : > { %1533 = vmatprep.mubr.f32.mxu0 %v2471_v0  ;;  %v1672_v62 = vpop.f32.mrf.mxu1 }
 0x459   : > { %v1674_v35 = vpop.f32.mrf.mxu1 }
 0x45a   : > { %2182 = vmatmul.mubr.msk.f32.gmra.mxu0 %vm1426_vm4, %v1421_v47 }
 0x45b   : > { %1539 = vmatprep.mubr.f32.mxu0 %v2471_v0  ;;  %v1678_v32 = vpop.f32.mrf.mxu1 }
 0x45d   : > { %v1680_v8 = vpop.f32.mrf.mxu1 }
 0x45e   : > { %2183 = vmatmul.mubr.msk.f32.gmra.mxu0 %vm1426_vm4, %v1422_v28  ;;  %v1717_v28 = vpop.permute.xlu1 %1716 }
 0x45f   : > { %1545 = vmatprep.mubr.f32.mxu0 %v2471_v0  ;;  %v1684_v5 = vpop.f32.mrf.mxu1 }
 0x461   : > { %v1686_v3 = vpop.f32.mrf.mxu1 }
 0x462   : > { %2184 = vmatmul.mubr.msk.f32.gmra.mxu0 %vm1426_vm4, %v1423_v20 }
 0x463   : > { %1551 = vmatprep.mubr.f32.mxu0 %v2471_v0  ;;  %v1690_v12 = vpop.f32.mrf.mxu1 }
 0x465   : > { %v1692_v36 = vpop.f32.mrf.mxu1 }
 0x466   : > { %2185 = vmatmul.mubr.msk.f32.gmra.mxu0 %vm1426_vm4, %v1424_v59 }
 0x467   : > { %1557 = vmatprep.mubr.f32.mxu0 %v2471_v0  ;;  %v1696_v51 = vpop.f32.mrf.mxu1 }
 0x469   : > { %v1698_v33 = vpop.f32.mrf.mxu1 }
 0x46a   : > { %2186 = vmatmul.mubr.msk.f32.gmra.mxu0 %vm1426_vm4, %v1425_v29 }
 0x46b   : > { %1925 = vmatprep.mubr.f32.mxu0 %v2471_v0 }
 0x50e   : > { %v3329_v10 = vpop.f32.mrf.mxu0 }
 0x510   : > { %v3331_v34 = vpop.f32.mrf.mxu0 }
 0x512   : > { %v1523_v9 = vpop.f32.mrf.mxu0 }
 0x514   : > { %v1525_v42 = vpop.f32.mrf.mxu0 }
 0x516   : > { %v1529_v7 = vpop.f32.mrf.mxu0 }
 0x517   : > { %v1667_v20 = vadd.f32 %v1666_v49, %v1529_v7  ;;  %v1655_v49 = vadd.f32 %v3323_v27, %v3329_v10 }
 0x518   : > { %v1531_v41 = vpop.f32.mrf.mxu0 }
 0x519   : > { %v1669_v19 = vadd.f32 %v1668_v50, %v1531_v41  ;;  %v1657_v50 = vadd.f32 %v3325_v30, %v3331_v34  ;;  %v1753_v7 = vadd.f32 %v1722_v52, %v1667_v20 }
 0x51a   : > { %v1535_v63 = vpop.f32.mrf.mxu0 }
 0x51b   : > { %v1673_v17 = vadd.f32 %v1672_v62, %v1535_v63  ;;  %v1754_v62 = vadd.f32 %v1722_v52, %v1669_v19  ;;  %v1769_v34 = vmax.f32 %v1753_v7, 0.0 }
 0x51c   : > { %v1537_v1 = vpop.f32.mrf.mxu0 }
 0x51d   : > { %v1675_v15 = vadd.f32 %v1674_v35, %v1537_v1  ;;  %v1661_v35 = vadd.f32 %v3327_v60, %v1523_v9 }
 0x51e   : > { %v1541_v6 = vpop.f32.mrf.mxu0 }
 0x51f   : > { %v1679_v13 = vadd.f32 %v1678_v32, %v1541_v6  ;;  %v1755_v32 = vadd.f32 %v1727_v38, %v1673_v17  ;;  %v1751_v60 = vadd.f32 %v1717_v28, %v1661_v35  ;;  %v1770_v6 = vmax.f32 %v1754_v62, 0.0 }
 0x520   : > { %v1543_v37 = vpop.f32.mrf.mxu0 }
 0x521   : > { %v1681_v55 = vadd.f32 %v1680_v8, %v1543_v37  ;;  %v1757_v59 = vadd.f32 %v1732_v11, %v1679_v13  ;;  %v1663_v8 = vadd.f32 %v1662_v48, %v1525_v42  ;;  %v1771_v9 = vmax.f32 %v1755_v32, 0.0 }
 0x522   : > { %v1547_v44 = vpop.f32.mrf.mxu0 }
 0x523   : > { %v1685_v26 = vadd.f32 %v1684_v5, %v1547_v44  ;;  %v1758_v46 = vadd.f32 %v1732_v11, %v1681_v55  ;;  %v1756_v5 = vadd.f32 %v1727_v38, %v1675_v15  ;;  %v1773_v63 = vmax.f32 %v1757_v59, 0.0  ;;  %v1781_v11 = vld [vmem:[%s3461_s7] sm:$0xff]  ;;  %v1782_v44 = vld [vmem:[%s3461_s7 + $0x8] sm:$0xff] }
 0x524   : > { %v1549_v31 = vpop.f32.mrf.mxu0  ;;  %v1752_v48 = vadd.f32 %v1717_v28, %v1663_v8  ;;  %v1786_v38 = vld [vmem:[%s3461_s7 + $0x28] sm:$0xff] }
 0x525   : > { %v1687_v2 = vadd.f32 %v1686_v3, %v1549_v31  ;;  %v1759_v58 = vadd.f32 %v1737_v4, %v1685_v26  ;;  %v1774_v41 = vmax.f32 %v1758_v46, 0.0  ;;  %v1772_v42 = vmax.f32 %v1756_v5, 0.0  ;;  %v1783_v31 = vld [vmem:[%s3461_s7 + $0x10] sm:$0xff] }
 0x526   : > { %v1553_v21 = vpop.f32.mrf.mxu0  ;;  %v1768_v37 = vmax.f32 %v1752_v48, 0.0 }
 0x527   : > { %v1691_v24 = vadd.f32 %v1690_v12, %v1553_v21  ;;  %v1760_v16 = vadd.f32 %v1737_v4, %v1687_v2  ;;  %v1712_v4 = vpop.permute.xlu1 %1711  ;;  %v1767_v12 = vmax.f32 %v1751_v60, 0.0  ;;  %v1785_v21 = vld [vmem:[%s3461_s7 + $0x20] sm:$0xff] }
 0x528   : > { %v1555_v53 = vpop.f32.mrf.mxu0  ;;  %v1750_v1 = vadd.f32 %v1712_v4, %v1657_v50  ;;  %v1749_v30 = vadd.f32 %v1712_v4, %v1655_v49 }
 0x529   : > { %v1693_v39 = vadd.f32 %v1692_v36, %v1555_v53  ;;  %v1761_v14 = vadd.f32 %v1742_v40, %v1691_v24  ;;  %v1776_v3 = vmax.f32 %v1760_v16, 0.0  ;;  %v1784_v36 = vld [vmem:[%s3461_s7 + $0x18] sm:$0xff]  ;;  %v1787_v53 = vld [vmem:[%s3461_s7 + $0x30] sm:$0xff] }
 0x52a   : > { %v1559_v22 = vpop.f32.mrf.mxu0  ;;  %v1766_v27 = vmax.f32 %v1750_v1, 0.0  ;;  %v1765_v10 = vmax.f32 %v1749_v30, 0.0 }
 0x52b   : > { %v1697_v54 = vadd.f32 %v1696_v51, %v1559_v22  ;;  %v1762_v56 = vadd.f32 %v1742_v40, %v1693_v39  ;;  %v1777_v29 = vmax.f32 %v1761_v14, 0.0  ;;  %v1775_v40 = vmax.f32 %v1759_v58, 0.0  ;;  %v1788_v51 = vld [vmem:[%s3461_s7 + $0x38] sm:$0xff]  ;;  %v1800_v22 = vpop.permute.xlu1 %1799 }
 0x52c   : > { %v1561_v25 = vpop.f32.mrf.mxu0 }
 0x52d   : > { %v1699_v43 = vadd.f32 %v1698_v33, %v1561_v25  ;;  %v1763_v61 = vadd.f32 %v1747_v23, %v1697_v54  ;;  %v1778_v47 = vmax.f32 %v1762_v56, 0.0 }
 0x52f   : > { %v1764_v45 = vadd.f32 %v1747_v23, %v1699_v43  ;;  %v1779_v18 = vmax.f32 %v1763_v61, 0.0  ;;  %v1805_v39 = vpop.permute.xlu1 %1804 }
 0x531   : > { %v1780_v57 = vmax.f32 %v1764_v45, 0.0 }
 0x533   : > { %1877 = vmatprep.subr.mxu0 %v1780_v57  ;;  %v1810_v54 = vpop.permute.xlu1 %1809 }
 0x534   : > { %1878 = vmatpush1.msra.mxu0 %v1779_v18 }
 0x535   : > { %1879 = vmatprep.subr.mxu0 %v1778_v47 }
 0x536   : > { %1880 = vmatpush1.msra.mxu0 %v1777_v29 }
 0x537   : > { %1881 = vmatprep.subr.mxu0 %v1776_v3  ;;  %v1815_v43 = vpop.permute.xlu1 %1814 }
 0x538   : > { %1882 = vmatpush1.msra.mxu0 %v1775_v40 }
 0x539   : > { %1883 = vmatprep.subr.mxu0 %v1774_v41 }
 0x53a   : > { %1884 = vmatpush1.msra.mxu0 %v1773_v63 }
 0x53b   : > { %1885 = vmatprep.subr.mxu0 %v1772_v42  ;;  %v1820_v15 = vpop.permute.xlu1 %1819 }
 0x53c   : > { %1886 = vmatpush1.msra.mxu0 %v1771_v9 }
 0x53d   : > { %1887 = vmatprep.subr.mxu0 %v1770_v6 }
 0x53e   : > { %1888 = vmatpush1.msra.mxu0 %v1769_v34 }
 0x53f   : > { %1889 = vmatprep.subr.mxu0 %v1768_v37  ;;  %v1825_v20 = vpop.permute.xlu1 %1824 }
 0x540   : > { %1890 = vmatpush1.msra.mxu0 %v1767_v12 }
 0x541   : > { %1891 = vmatprep.subr.mxu0 %v1766_v27 }
 0x542   : > { %1892 = vmatpush1.msra.mxu0 %v1765_v10 }
 0x543   : > { %2195 = vmatmul.mubr.msk.f32.vlgmr.msra.gmra.mxu0 %vm3476_vm5, %v1781_v11  ;;  %v1830_v62 = vpop.permute.xlu1 %1829 }
 0x544   : > { %1931 = vmatprep.mubr.f32.mxu0 %v2471_v0 }
 0x547   : > { %2196 = vmatmul.mubr.msk.f32.gmra.mxu0 %vm3477_vm6, %v1782_v44  ;;  %v1835_v1 = vpop.permute.xlu1 %1834 }
 0x548   : > { %1937 = vmatprep.mubr.f32.mxu0 %v2471_v0 }
 0x54b   : > { %2197 = vmatmul.mubr.msk.f32.gmra.mxu0 %vm3478_vm9, %v1783_v31 }
 0x54c   : > { %1943 = vmatprep.mubr.f32.mxu0 %v2471_v0 }
 0x54f   : > { %2198 = vmatmul.mubr.msk.f32.gmra.mxu0 %vm3479_vm1, %v1784_v36 }
 0x550   : > { %1949 = vmatprep.mubr.f32.mxu0 %v2471_v0 }
 0x553   : > { %2199 = vmatmul.mubr.msk.f32.gmra.mxu0 %vm3480_vm2, %v1785_v21 }
 0x554   : > { %1955 = vmatprep.mubr.f32.mxu0 %v2471_v0 }
 0x557   : > { %2200 = vmatmul.mubr.msk.f32.gmra.mxu0 %vm3481_vm3, %v1786_v38 }
 0x558   : > { %1961 = vmatprep.mubr.f32.mxu0 %v2471_v0 }
 0x55b   : > { %2201 = vmatmul.mubr.msk.f32.gmra.mxu0 %vm3482_vm13, %v1787_v53 }
 0x55c   : > { %1967 = vmatprep.mubr.f32.mxu0 %v2471_v0 }
 0x55f   : > { %2202 = vmatmul.mubr.msk.f32.gmra.mxu0 %vm3483_vm11, %v1788_v51 }
 0x603   : > { %v1927_v23 = vpop.f32.mrf.mxu0 }
 0x604   : > { %v1928_v24 = vadd.f32 %v1927_v23, %v1800_v22 }
 0x605   : > { %v1929_v33 = vpop.f32.mrf.mxu0 }
 0x606   : > { %v1974_v25 = vmax.f32 %v1928_v24, 0.0  ;;  %v1930_v2 = vadd.f32 %v1929_v33, %v1800_v22 }
 0x607   : > { %v1933_v52 = vpop.f32.mrf.mxu0 }
 0x608   : > { %1990 = vst [vmem:[%s3380_s24] sm:$0xff] %v1974_v25  ;;  %v1975_v0 = vmax.f32 %v1930_v2, 0.0  ;;  %v1934_v26 = vadd.f32 %v1933_v52, %v1805_v39 }
 0x609   : > { %v1935_v61 = vpop.f32.mrf.mxu0 }
 0x60a   : > { %1991 = vst [vmem:[%s3380_s24 + $0x8] sm:$0xff] %v1975_v0  ;;  %v1976_v55 = vmax.f32 %v1934_v26, 0.0  ;;  %v1936_v56 = vadd.f32 %v1935_v61, %v1805_v39 }
 0x60b   : > { %v1939_v45 = vpop.f32.mrf.mxu0 }
 0x60c   : > { %1992 = vst [vmem:[%s3380_s24 + $0x10] sm:$0xff] %v1976_v55  ;;  %v1977_v13 = vmax.f32 %v1936_v56, 0.0  ;;  %v1940_v14 = vadd.f32 %v1939_v45, %v1810_v54 }
 0x60d   : > { %v1941_v16 = vpop.f32.mrf.mxu0 }
 0x60e   : > { %1993 = vst [vmem:[%s3380_s24 + $0x18] sm:$0xff] %v1977_v13  ;;  %v1978_v57 = vmax.f32 %v1940_v14, 0.0  ;;  %v1942_v17 = vadd.f32 %v1941_v16, %v1810_v54 }
 0x60f   : > { %v1945_v58 = vpop.f32.mrf.mxu0 }
 0x610   : > { %1994 = vst [vmem:[%s3380_s24 + $0x20] sm:$0xff] %v1978_v57  ;;  %v1979_v18 = vmax.f32 %v1942_v17, 0.0  ;;  %v1946_v19 = vadd.f32 %v1945_v58, %v1815_v43 }
 0x611   : > { %v1947_v46 = vpop.f32.mrf.mxu0 }
 0x612   : > { %1995 = vst [vmem:[%s3380_s24 + $0x28] sm:$0xff] %v1979_v18  ;;  %v1980_v47 = vmax.f32 %v1946_v19, 0.0  ;;  %v1948_v28 = vadd.f32 %v1947_v46, %v1815_v43 }
 0x613   : > { %v1951_v59 = vpop.f32.mrf.mxu0 }
 0x614   : > { %1996 = vst [vmem:[%s3380_s24 + $0x30] sm:$0xff] %v1980_v47  ;;  %v1981_v29 = vmax.f32 %v1948_v28, 0.0  ;;  %v1952_v8 = vadd.f32 %v1951_v59, %v1820_v15 }
 0x615   : > { %v1953_v5 = vpop.f32.mrf.mxu0 }
 0x616   : > { %1997 = vst [vmem:[%s3380_s24 + $0x38] sm:$0xff] %v1981_v29  ;;  %v1982_v3 = vmax.f32 %v1952_v8, 0.0  ;;  %v1954_v35 = vadd.f32 %v1953_v5, %v1820_v15 }
 0x617   : > { %v1957_v32 = vpop.f32.mrf.mxu0 }
 0x618   : > { %1998 = vst [vmem:[%s3380_s24 + $0x40] sm:$0xff] %v1982_v3  ;;  %v1983_v40 = vmax.f32 %v1954_v35, 0.0  ;;  %v1958_v50 = vadd.f32 %v1957_v32, %v1825_v20 }
 0x619   : > { %v1959_v41 = vpop.f32.mrf.mxu0 }
 0x61a   : > { %1999 = vst [vmem:[%s3380_s24 + $0x48] sm:$0xff] %v1983_v40  ;;  %v1984_v49 = vmax.f32 %v1958_v50, 0.0  ;;  %v1960_v7 = vadd.f32 %v1959_v41, %v1825_v20 }
 0x61b   : > { %v1963_v63 = vpop.f32.mrf.mxu0 }
 0x61c   : > { %2000 = vst [vmem:[%s3380_s24 + $0x50] sm:$0xff] %v1984_v49  ;;  %v1985_v48 = vmax.f32 %v1960_v7, 0.0  ;;  %v1964_v42 = vadd.f32 %v1963_v63, %v1830_v62 }
 0x61d   : > { %v1965_v4 = vpop.f32.mrf.mxu0 }
 0x61e   : > { %2001 = vst [vmem:[%s3380_s24 + $0x58] sm:$0xff] %v1985_v48  ;;  %v1986_v60 = vmax.f32 %v1964_v42, 0.0  ;;  %v1966_v9 = vadd.f32 %v1965_v4, %v1830_v62 }
 0x61f   : > { %v1969_v6 = vpop.f32.mrf.mxu0 }
 0x620   : > { %2002 = vst [vmem:[%s3380_s24 + $0x60] sm:$0xff] %v1986_v60  ;;  %v1987_v30 = vmax.f32 %v1966_v9, 0.0  ;;  %v1970_v34 = vadd.f32 %v1969_v6, %v1835_v1 }
 0x621   : > { %v1971_v37 = vpop.f32.mrf.mxu0 }
 0x622   : > { %2003 = vst [vmem:[%s3380_s24 + $0x68] sm:$0xff] %v1987_v30  ;;  %v1988_v12 = vmax.f32 %v1970_v34, 0.0  ;;  %v1972_v27 = vadd.f32 %v1971_v37, %v1835_v1 }
 0x624   : > { %2004 = vst [vmem:[%s3380_s24 + $0x70] sm:$0xff] %v1988_v12  ;;  %v1989_v10 = vmax.f32 %v1972_v27, 0.0 }
 0x626   : > { %2005 = vst [vmem:[%s3380_s24 + $0x78] sm:$0xff] %v1989_v10 }
 0x627   : > { %2406 = shalt.err (!%p2403_p5)
}
 0x628   : > { %s2407_s18 = scalar_lea.hbm %s3401_s29, 2048  ;;  %s2411_s27 = scalar_lea.hbm %s3463_s9, 4096 }
 0x629   : > { %p2408_p6 = scmp.ne.s32.totalorder %s3401_s29, %s2407_s18  ;;  %p2412_p10 = scmp.lt.s32.totalorder %s3401_s29, %s3463_s9 }
 0x62a   : > { %p2413_p11 = scmp.lt.s32.totalorder %s2411_s27, %s2407_s18 }
 0x62b   : > { %p2409_p7 = pnand %p2408_p6, %p2566_p4 }
 0x62c   : > { %p2414_p12 = por %p2413_p11, %p2412_p10 }
 0x62d   : > { %p2410_p9 = pneg %p2409_p7 }
 0x62f   : > { %p2415_p13 = pnand %p2414_p12, %p2410_p9 }
 0x631   : > { %2418 = shalt.err (!%p2415_p13)
}
 0x632   : > { %s2474_s15 = smov 256   ;;  %s2475_s23 = smov 16  }
 0x633   : > { %2316 = dma.vmem_to_hbm [thread:$0]  (%p2566_p4), %s3403_s26, 2048, %s3401_s29, %s3409_s12, %s2474_s15, %s2474_s15, %s2475_s23  }
 0x634 PF: > { %p2322_p0 = scmp.ge.s32.totalorder %s2469_s14, 2  ;;  %s2037_s20 = sand.u32 1, %s2449_s30  }
 0x635   : > { %s2038_s18 = scalar_lea.sflag [#allocation4], %s2037_s20 }
 0x636   : > { %p2319_p1 = pnand %p2322_p0, %p2573_p8 }
 0x638   : > { %p2320_p2 = pneg %p2319_p1 }
 0x63a   : > { %2444 = dma.done.wait (%p2320_p2), %s2038_s18, 2048  }
 0x63b   : > { %2446 = vsyncadd (%p2320_p2), %s2038_s18, 4294965248  ;;  %s22_s14 = sadd.s32 1, %s2469_s14   ;;  %s3484_s30 = smov %s2453_s10 }
 0x63c   : > { %p19_p3 = scmp.ge.s32.totalorder %s22_s14, 4   ;;  %s3485_s10 = smov %s2457_s11 }
 0x63d   : > { %s3486_s11 = smov %s2579_s22  ;;  %s3487_s12 = smov %s2465_s13 }
 0x63e   : > { %s3488_s13 = smov %s3490_s17  ;;  %21 = sbr.rel (!%p19_p3) target bundleno = 4 (0x4), region = 102 }
 0x643   :  { %2043 = vsyncpa [#allocation4], 1 }
 0x644   :  { %2045 = vsyncpa [#allocation4 + $0x1], 1 }

</bundles_post_ra>
